<compile_context>
chip_gen: v5e
topology: v5e:2x2
jax: 0.10.0
libtpu: 0.0.40
codegen_flags: <defaults>
</compile_context>

<pallas_src>
import functools

import jax
import jax.numpy as jnp
from jax import lax
from jax.experimental import pallas as pl
from jax.experimental.pallas import tpu as pltpu


# Raised scoped-VMEM budget: above the 16 MiB (v5e) / 32 MiB (v6e, v7x) scoped
# defaults, safely below v7x's 64 MiB physical per-TensorCore VMEM.
VMEM_LIMIT_BYTES = 48 * 1024 * 1024

# Production matmul / activation-streaming dtype (bf16 MXUs on v5e/v6e/v7x).
DEFAULT_MATMUL_DTYPE = jnp.bfloat16


def _choose_tile(dim, requested, align):
    """Largest tile <= requested that divides `dim` and is `align`-aligned,
    or the full dim if it already fits.  Returns None if no such tile exists
    (caller must pad)."""
    if dim <= requested:
        return dim
    t = (requested // align) * align
    while t >= align:
        if dim % t == 0:
            return t
        t -= align
    return None


# ----------------------------------------------------------------------------
# Generic tiled dense kernel:  y[M, N] = x[M, K] @ w[K, N] + b[1, N]
# ----------------------------------------------------------------------------
def _dense_kernel(x_ref, w_ref, b_ref, o_ref):
    acc = jnp.dot(x_ref[...].astype(w_ref.dtype), w_ref[...],
                  preferred_element_type=jnp.float32)
    o_ref[...] = (acc + b_ref[...].astype(jnp.float32)).astype(o_ref.dtype)


def dense(x2d, w, b, *, out_dtype=jnp.float32, tm=256, tn=512):
    """Tiled dense over a parallel (M, N) grid with full-K blocks.

    Grid order is chosen from an HBM-traffic model: the operand whose block
    index is constant along the *inner* grid axis stays VMEM-resident and is
    streamed from HBM exactly once (critical for the H x V output projection).
    """
    M, K = x2d.shape
    N = w.shape[1]

    m_align = 16 if jnp.dtype(x2d.dtype).itemsize == 2 else 8

    # M (activation) tiling: prefer an exact divisor; pad rows only as fallback.
    tm_eff = _choose_tile(M, tm, m_align)
    if tm_eff is None:
        tm_eff = tm
    Mp = -(-M // tm_eff) * tm_eff
    if Mp != M:
        x2d = jnp.pad(x2d, ((0, Mp - M), (0, 0)))

    # N (weight) tiling: weights are pre-padded by prepare_params(), so this
    # normally never pads per call; fallback kept for robustness.
    tn_eff = _choose_tile(N, tn, 128)
    if tn_eff is None:
        tn_eff = tn
    Np = -(-N // tn_eff) * tn_eff
    if Np != N:
        w = jnp.pad(w, ((0, 0), (0, Np - N)))
        b = jnp.pad(b, ((0, 0), (0, Np - N)))

    grid_m = Mp // tm_eff
    grid_n = Np // tn_eff

    bytes_x = Mp * K * jnp.dtype(x2d.dtype).itemsize
    bytes_w = K * Np * jnp.dtype(w.dtype).itemsize
    traffic_m_outer = bytes_x + bytes_w * grid_m   # x resident on inner N sweep
    traffic_n_outer = bytes_w + bytes_x * grid_n   # w resident on inner M sweep
    n_outer = traffic_n_outer < traffic_m_outer

    if n_outer:
        grid = (grid_n, grid_m)
        x_map = lambda j, i: (i, 0)
        w_map = lambda j, i: (0, j)
        o_map = lambda j, i: (i, j)
    else:
        grid = (grid_m, grid_n)
        x_map = lambda i, j: (i, 0)
        w_map = lambda i, j: (0, j)
        o_map = lambda i, j: (i, j)

    # TODO(synk): for K >= 4096 add a reduction grid axis ("arbitrary") with a
    # VMEM f32 accumulator instead of full-K blocks (v7x 64 MiB VMEM budget).
    out = pl.pallas_call(
        _dense_kernel,
        out_shape=jax.ShapeDtypeStruct((Mp, Np), out_dtype),
        grid_spec=pltpu.PrefetchScalarGridSpec(
            num_scalar_prefetch=0,
            grid=grid,
            in_specs=[
                pl.BlockSpec((tm_eff, K), x_map),
                pl.BlockSpec((K, tn_eff), w_map),
                pl.BlockSpec((1, tn_eff), w_map),
            ],
            out_specs=pl.BlockSpec((tm_eff, tn_eff), o_map),
        ),
        compiler_params=pltpu.CompilerParams(
            dimension_semantics=("parallel", "parallel"),
            vmem_limit_bytes=VMEM_LIMIT_BYTES),
    )(x2d, w, b)

    if Mp != M or Np != N:
        out = out[:M, :N]
    return out


# ----------------------------------------------------------------------------
# GRU recurrence kernel.  Per timestep only ONE fused matmul h @ W_hh_all.
#   xg:    (B, T, 3H)  precomputed x@W_ih with (r,z) biases folded in
#   w_hh:  (H, 3H)     fused hidden->hidden weights, gate order (r, z, n)
#   b_hn:  (1, H)      hidden bias of the n gate (stays inside r*(...))
# ----------------------------------------------------------------------------
def _gru_kernel(xg_ref, w_hh_ref, b_hn_ref, h_out_ref, h_ref, *, Tc, H):
    # Grid = (batch_chunks, T/Tc); h carry re-initialised per batch chunk.
    @pl.when(pl.program_id(1) == 0)
    def _():
        h_ref[...] = jnp.zeros_like(h_ref)

    w = w_hh_ref[...]                          # (H, 3H), VMEM-resident
    b_hn = b_hn_ref[...].astype(jnp.float32)   # (1, H)
    h = h_ref[...]                             # (Bc, H) f32 carry

    # Statically unrolled chunk of Tc timesteps; one fused MXU matmul per step.
    # TODO(synk): if vreg spills show up at large B*Tc, drop Tc or switch to
    # lax.fori_loop(..., unroll=4).
    for i in range(Tc):
        hg = jnp.dot(h.astype(w.dtype), w, preferred_element_type=jnp.float32)
        xt = xg_ref[:, i, :].astype(jnp.float32)
        r = jax.nn.sigmoid(xt[:, :H] + hg[:, :H])
        z = jax.nn.sigmoid(xt[:, H:2 * H] + hg[:, H:2 * H])
        n = jnp.tanh(xt[:, 2 * H:] + r * (hg[:, 2 * H:] + b_hn))
        h = (1.0 - z) * n + z * h
        h_out_ref[:, i, :] = h.astype(h_out_ref.dtype)

    h_ref[...] = h


def gru_recurrence(xg, w_hh, b_hn, *, out_dtype=jnp.float32, batch_chunks=1,
                   single_buffer_weights=True):
    B, T, G = xg.shape
    H = G // 3

    if batch_chunks < 1 or B % batch_chunks != 0:
        batch_chunks = 1
    Bc = B // batch_chunks

    # Timestep chunk per grid step; the block's 2nd-to-last dim must be sublane
    # aligned (8 f32 / 16 bf16) unless it equals the full (padded) T extent.
    sub = 16 if jnp.dtype(xg.dtype).itemsize == 2 else 8
    Tc = next((c for c in (32, 16, 8) if c >= sub and T % c == 0), None)
    if Tc is None:
        Tc = T if T <= 32 else 32
    Tp = -(-T // Tc) * Tc
    if Tp != T:
        xg = jnp.pad(xg, ((0, 0), (0, Tp - T), (0, 0)))

    # Constant-index weight blocks: single-buffered (double-buffering them is
    # pure wasted VMEM — matters at H=1024 on v7x's 64 MiB VMEM).
    if single_buffer_weights:
        w_spec = pl.BlockSpec((H, 3 * H), lambda b, c: (0, 0),
                              pipeline_mode=pl.Buffered(1))
        bn_spec = pl.BlockSpec((1, H), lambda b, c: (0, 0),
                               pipeline_mode=pl.Buffered(1))
    else:
        w_spec = pl.BlockSpec((H, 3 * H), lambda b, c: (0, 0))
        bn_spec = pl.BlockSpec((1, H), lambda b, c: (0, 0))

    kernel = functools.partial(_gru_kernel, Tc=Tc, H=H)

    h_all = pl.pallas_call(
        kernel,
        out_shape=jax.ShapeDtypeStruct((B, Tp, H), out_dtype),
        grid_spec=pltpu.PrefetchScalarGridSpec(
            num_scalar_prefetch=0,
            grid=(batch_chunks, Tp // Tc),
            in_specs=[
                pl.BlockSpec((Bc, Tc, 3 * H), lambda b, c: (b, c, 0)),  # xg chunk
                w_spec,                                                  # w_hh
                bn_spec,                                                 # b_hn
            ],
            out_specs=pl.BlockSpec((Bc, Tc, H), lambda b, c: (b, c, 0)),
            scratch_shapes=[pltpu.VMEM((Bc, H), jnp.float32)],           # h carry
        ),
        compiler_params=pltpu.CompilerParams(
            # Batch-chunk axis parallel (shards across v7x's 2 TensorCores);
            # the time axis carries the recurrence and stays sequential.
            dimension_semantics=("parallel", "arbitrary"),
            vmem_limit_bytes=VMEM_LIMIT_BYTES),
    )(xg, w_hh, b_hn)

    if Tp != T:
        h_all = h_all[:, :T, :]
    return h_all


# ----------------------------------------------------------------------------
# One-time parameter prep: cast weights to the matmul dtype ONCE (not per
# forward), pre-fold (r, z) biases, pad the vocab dim of W_out to a multiple
# of 128 so the projection never pads per call and stores stay lane-dense.
# ----------------------------------------------------------------------------
def prepare_params(params, matmul_dtype=DEFAULT_MATMUL_DTYPE, lane=128):
    emb, w_ih, w_hh = params["embedding"], params["w_ih"], params["w_hh"]
    b_ih, b_hh = params["b_ih"], params["b_hh"]
    w_out, b_out = params["w_out"], params["b_out"]
    H = w_hh.shape[0]
    V = w_out.shape[1]

    b_pre = jnp.concatenate(
        [b_ih[:, :2 * H] + b_hh[:, :2 * H], b_ih[:, 2 * H:]], axis=-1)  # (1, 3H)
    b_hn = b_hh[:, 2 * H:]                                              # (1, H)

    Vp = -(-V // lane) * lane
    if Vp != V:
        w_out = jnp.pad(w_out, ((0, 0), (0, Vp - V)))
        b_out = jnp.pad(b_out, ((0, 0), (0, Vp - V)))

    return {
        "embedding": emb.astype(matmul_dtype),
        "w_ih": w_ih.astype(matmul_dtype),
        "w_hh": w_hh.astype(matmul_dtype),
        "w_out": w_out.astype(matmul_dtype),
        "b_pre": b_pre.astype(jnp.float32),   # biases stay f32
        "b_hn": b_hn.astype(jnp.float32),
        "b_out": b_out.astype(jnp.float32),
    }


# ----------------------------------------------------------------------------
# Full forward pass.
# ----------------------------------------------------------------------------
def language_model_forward(token_ids, prepared, *, vocab_size=None,
                           single_buffer_weights=True, gru_batch_chunks=2):
    """token_ids: int32 [B, T]  ->  logits float32 [B, T, V]."""
    emb = prepared["embedding"]      # (V, E)   matmul dtype
    w_ih = prepared["w_ih"]          # (E, 3H)  gates (r, z, n) concat on columns
    w_hh = prepared["w_hh"]          # (H, 3H)
    b_pre = prepared["b_pre"]        # (1, 3H)  f32, (r,z) biases pre-summed
    b_hn = prepared["b_hn"]          # (1, H)   f32
    w_out = prepared["w_out"]        # (H, Vp)
    b_out = prepared["b_out"]        # (1, Vp)  f32

    B, T = token_ids.shape
    H = w_hh.shape[0]
    Vp = w_out.shape[1]
    act_dtype = w_hh.dtype           # activation streaming dtype == matmul dtype

    # 1) Embedding lookup (batch-major, table already in matmul dtype).
    # TODO(synk): fuse this gather into the xg dense via scalar-prefetch +
    # pl.Element row gather to skip the HBM round trip of x.
    x = jnp.take(emb, token_ids, axis=0)                                # (B, T, E)

    # 2) Input pre-activations for all gates / timesteps in one big matmul,
    #    streamed in the compact activation dtype.
    xg = dense(x.reshape(B * T, x.shape[-1]), w_ih, b_pre,
               out_dtype=act_dtype).reshape(B, T, 3 * H)

    # 3) Serial GRU recurrence (only h @ W_hh_all on the critical path).
    chunks = gru_batch_chunks if (gru_batch_chunks >= 1 and B % gru_batch_chunks == 0) else 1
    h_all = gru_recurrence(xg, w_hh, b_hn, out_dtype=act_dtype,
                           batch_chunks=chunks,
                           single_buffer_weights=single_buffer_weights)  # (B, T, H)

    # 4) Hoisted output projection; W_out stays VMEM-resident across the inner
    #    M sweep (read from HBM once), f32 logits.
    logits = dense(h_all.reshape(B * T, H), w_out, b_out,
                   out_dtype=jnp.float32, tm=512).reshape(B, T, Vp)

    if vocab_size is not None and vocab_size != Vp:
        logits = logits[:, :, :vocab_size]
    return logits


# ----------------------------------------------------------------------------
# Pure-JAX reference (same math / same parameter layout) for correctness check.
# ----------------------------------------------------------------------------
def reference_forward(token_ids, params):
    emb = params["embedding"]
    w_ih, w_hh = params["w_ih"], params["w_hh"]
    b_ih, b_hh = params["b_ih"], params["b_hh"]
    w_out, b_out = params["w_out"], params["b_out"]

    B, T = token_ids.shape
    H = w_hh.shape[0]
    x_tbe = jnp.transpose(jnp.take(emb, token_ids, axis=0), (1, 0, 2))

    def step(h, x_t):
        gi = x_t @ w_ih + b_ih                 # (B, 3H)
        gh = h @ w_hh + b_hh                   # (B, 3H)
        r = jax.nn.sigmoid(gi[:, :H] + gh[:, :H])
        z = jax.nn.sigmoid(gi[:, H:2 * H] + gh[:, H:2 * H])
        n = jnp.tanh(gi[:, 2 * H:] + r * gh[:, 2 * H:])
        h_new = (1.0 - z) * n + z * h
        return h_new, h_new @ w_out + b_out

    _, logits_tbv = lax.scan(step, jnp.zeros((B, H), jnp.float32), x_tbe)
    return jnp.transpose(logits_tbv, (1, 0, 2))


def init_params(key, vocab_size, emb_dim, hidden_dim):
    ks = jax.random.split(key, 7)
    s = 0.1
    H = hidden_dim
    return {
        "embedding": s * jax.random.normal(ks[0], (vocab_size, emb_dim), jnp.float32),
        "w_ih": s * jax.random.normal(ks[1], (emb_dim, 3 * H), jnp.float32),
        "w_hh": s * jax.random.normal(ks[2], (H, 3 * H), jnp.float32),
        "b_ih": s * jax.random.normal(ks[3], (1, 3 * H), jnp.float32),
        "b_hh": s * jax.random.normal(ks[4], (1, 3 * H), jnp.float32),
        "w_out": s * jax.random.normal(ks[5], (hidden_dim, vocab_size), jnp.float32),
        "b_out": s * jax.random.normal(ks[6], (1, vocab_size), jnp.float32),
    }


if __name__ == "__main__":
    # Small shapes consistent with the module's hyperparameters (scaled down).
    B, T = 2, 8          # batch, sequence length
    V = 50               # vocab size (<= max_vocab_size)
    E, H = 32, 32        # token_embedding_size, rnn_hidden_dim

    key = jax.random.PRNGKey(0)
    k_tok, k_par = jax.random.split(key)
    token_ids = jax.random.randint(k_tok, (B, T), 0, V, dtype=jnp.int32)
    params = init_params(k_par, V, E, H)

    ref = reference_forward(token_ids, params)

    def run(matmul_dtype, single_buffer):
        prep = prepare_params(params, matmul_dtype=matmul_dtype)
        fwd = jax.jit(functools.partial(language_model_forward,
                                        vocab_size=V,
                                        single_buffer_weights=single_buffer))
        return jax.block_until_ready(fwd(token_ids, prep))

    def run_with_fallback(matmul_dtype):
        # Prefer single-buffered (pl.Buffered(1)) resident GRU weights; fall
        # back to default double-buffering if this JAX build rejects it.
        try:
            return run(matmul_dtype, True)
        except Exception:
            return run(matmul_dtype, False)

    # Exact check in f32.
    logits_f32 = run_with_fallback(jnp.float32)
    assert logits_f32.shape == (B, T, V) and logits_f32.dtype == jnp.float32
    assert jnp.allclose(logits_f32, ref, atol=1e-4, rtol=1e-4), "f32 mismatch vs reference"

    # Production bf16 weights / activation streams: looser tolerance vs f32 ref.
    logits_bf16 = run_with_fallback(jnp.bfloat16)
    assert logits_bf16.shape == (B, T, V) and logits_bf16.dtype == jnp.float32
    assert jnp.allclose(logits_bf16, ref, atol=5e-2, rtol=5e-2), "bf16 mismatch vs reference"

    print("KERNEL_OK")
</pallas_src>

<mosaic_0001>
module attributes {stable_mosaic.version = 11 : i64} {
  func.func @_dense_kernel(%arg0: i32, %arg1: i32, %arg2: memref<16x32xf32, #tpu.memory_space<vmem>>, %arg3: memref<32x96xf32, #tpu.memory_space<vmem>>, %arg4: memref<1x96xf32, #tpu.memory_space<vmem>>, %arg5: memref<16x96xf32, #tpu.memory_space<vmem>>) attributes {dimension_semantics = [#tpu.dimension_semantics<parallel>, #tpu.dimension_semantics<parallel>], iteration_bounds = array<i64: 1, 1>, scalar_prefetch = 0 : i64, scratch_operands = 0 : i64, tpu.core_type = #tpu.core_type<tc>, window_params = [{transform_indices = @transform_0, window_bounds = array<i64: 16, 32>}, {transform_indices = @transform_1, window_bounds = array<i64: 32, 96>}, {transform_indices = @transform_2, window_bounds = array<i64: 1, 96>}, {transform_indices = @transform_3, window_bounds = array<i64: 16, 96>}]} {
    %c0 = arith.constant 0 : index
    %c0_0 = arith.constant 0 : index
    %0 = vector.load %arg2[%c0, %c0_0] : memref<16x32xf32, #tpu.memory_space<vmem>>, vector<16x32xf32>
    %c0_1 = arith.constant 0 : index
    %c0_2 = arith.constant 0 : index
    %1 = vector.load %arg3[%c0_1, %c0_2] : memref<32x96xf32, #tpu.memory_space<vmem>>, vector<32x96xf32>
    %cst = arith.constant dense<0.000000e+00> : vector<16x96xf32>
    %2 = tpu.matmul %0, %1, %cst {dimension_numbers = #tpu.dot_dimension_numbers<[1], [0], [0], [1], [0, 0, 1, 1], [], []>} : vector<16x32xf32>, vector<32x96xf32>, vector<16x96xf32> -> vector<16x96xf32>
    %c0_3 = arith.constant 0 : index
    %c0_4 = arith.constant 0 : index
    %3 = vector.load %arg4[%c0_3, %c0_4] : memref<1x96xf32, #tpu.memory_space<vmem>>, vector<1x96xf32>
    %4 = vector.broadcast %3 : vector<1x96xf32> to vector<16x96xf32>
    %5 = arith.addf %2, %4 : vector<16x96xf32>
    %c0_5 = arith.constant 0 : index
    %c0_6 = arith.constant 0 : index
    %6 = vector.load %arg5[%c0_5, %c0_6] : memref<16x96xf32, #tpu.memory_space<vmem>>, vector<16x96xf32>
    tpu.vector_store %arg5[%c0_5, %c0_6], %5 {strides = array<i32>} : memref<16x96xf32, #tpu.memory_space<vmem>>, vector<16x96xf32>,
    return
  }
  func.func @transform_0(%arg0: i32, %arg1: i32) -> (i32, i32) {
    %c0_i32 = arith.constant 0 : i32
    %c0_i32_0 = arith.constant 0 : i32
    return %arg0, %c0_i32 : i32, i32
  }
  func.func @transform_1(%arg0: i32, %arg1: i32) -> (i32, i32) {
    %c0_i32 = arith.constant 0 : i32
    %c0_i32_0 = arith.constant 0 : i32
    return %c0_i32, %arg1 : i32, i32
  }
  func.func @transform_2(%arg0: i32, %arg1: i32) -> (i32, i32) {
    %c0_i32 = arith.constant 0 : i32
    %c0_i32_0 = arith.constant 0 : i32
    return %c0_i32, %arg1 : i32, i32
  }
  func.func @transform_3(%arg0: i32, %arg1: i32) -> (i32, i32) {
    %c0_i32 = arith.constant 0 : i32
    return %arg0, %arg1 : i32, i32
  }
}

module attributes {stable_mosaic.version = 11 : i64} {
  func.func @_dense_kernel(%arg0: i32, %arg1: i32, %arg2: memref<16x32xf32, #tpu.memory_space<vmem>>, %arg3: memref<32x128xf32, #tpu.memory_space<vmem>>, %arg4: memref<1x128xf32, #tpu.memory_space<vmem>>, %arg5: memref<16x128xf32, #tpu.memory_space<vmem>>) attributes {dimension_semantics = [#tpu.dimension_semantics<parallel>, #tpu.dimension_semantics<parallel>], iteration_bounds = array<i64: 1, 1>, scalar_prefetch = 0 : i64, scratch_operands = 0 : i64, tpu.core_type = #tpu.core_type<tc>, window_params = [{transform_indices = @transform_0, window_bounds = array<i64: 16, 32>}, {transform_indices = @transform_1, window_bounds = array<i64: 32, 128>}, {transform_indices = @transform_2, window_bounds = array<i64: 1, 128>}, {transform_indices = @transform_3, window_bounds = array<i64: 16, 128>}]} {
    %c0 = arith.constant 0 : index
    %c0_0 = arith.constant 0 : index
    %0 = vector.load %arg2[%c0, %c0_0] : memref<16x32xf32, #tpu.memory_space<vmem>>, vector<16x32xf32>
    %c0_1 = arith.constant 0 : index
    %c0_2 = arith.constant 0 : index
    %1 = vector.load %arg3[%c0_1, %c0_2] : memref<32x128xf32, #tpu.memory_space<vmem>>, vector<32x128xf32>
    %cst = arith.constant dense<0.000000e+00> : vector<16x128xf32>
    %2 = tpu.matmul %0, %1, %cst {dimension_numbers = #tpu.dot_dimension_numbers<[1], [0], [0], [1], [0, 0, 1, 1], [], []>} : vector<16x32xf32>, vector<32x128xf32>, vector<16x128xf32> -> vector<16x128xf32>
    %c0_3 = arith.constant 0 : index
    %c0_4 = arith.constant 0 : index
    %3 = vector.load %arg4[%c0_3, %c0_4] : memref<1x128xf32, #tpu.memory_space<vmem>>, vector<1x128xf32>
    %4 = vector.broadcast %3 : vector<1x128xf32> to vector<16x128xf32>
    %5 = arith.addf %2, %4 : vector<16x128xf32>
    %c0_5 = arith.constant 0 : index
    %c0_6 = arith.constant 0 : index
    %6 = vector.load %arg5[%c0_5, %c0_6] : memref<16x128xf32, #tpu.memory_space<vmem>>, vector<16x128xf32>
    tpu.vector_store %arg5[%c0_5, %c0_6], %5 {strides = array<i32>} : memref<16x128xf32, #tpu.memory_space<vmem>>, vector<16x128xf32>,
    return
  }
  func.func @transform_0(%arg0: i32, %arg1: i32) -> (i32, i32) {
    %c0_i32 = arith.constant 0 : i32
    %c0_i32_0 = arith.constant 0 : i32
    return %arg0, %c0_i32 : i32, i32
  }
  func.func @transform_1(%arg0: i32, %arg1: i32) -> (i32, i32) {
    %c0_i32 = arith.constant 0 : i32
    %c0_i32_0 = arith.constant 0 : i32
    return %c0_i32, %arg1 : i32, i32
  }
  func.func @transform_2(%arg0: i32, %arg1: i32) -> (i32, i32) {
    %c0_i32 = arith.constant 0 : i32
    %c0_i32_0 = arith.constant 0 : i32
    return %c0_i32, %arg1 : i32, i32
  }
  func.func @transform_3(%arg0: i32, %arg1: i32) -> (i32, i32) {
    %c0_i32 = arith.constant 0 : i32
    return %arg0, %arg1 : i32, i32
  }
}

module attributes {stable_mosaic.version = 11 : i64} {
  func.func @_gru_kernel(%arg0: i32, %arg1: i32, %arg2: memref<1x8x96xf32, #tpu.memory_space<vmem>>, %arg3: memref<32x96xf32, #tpu.memory_space<vmem>>, %arg4: memref<1x32xf32, #tpu.memory_space<vmem>>, %arg5: memref<1x8x32xf32, #tpu.memory_space<vmem>>, %arg6: memref<1x32xf32, #tpu.memory_space<vmem>>) attributes {dimension_semantics = [#tpu.dimension_semantics<parallel>, #tpu.dimension_semantics<arbitrary>], iteration_bounds = array<i64: 2, 1>, scalar_prefetch = 0 : i64, scratch_operands = 1 : i64, tpu.core_type = #tpu.core_type<tc>, window_params = [{transform_indices = @transform_0, window_bounds = array<i64: 1, 8, 96>}, {pipeline_mode = #tpu.pipeline_mode<synchronous>, transform_indices = @transform_1, window_bounds = array<i64: 32, 96>}, {pipeline_mode = #tpu.pipeline_mode<synchronous>, transform_indices = @transform_2, window_bounds = array<i64: 1, 32>}, {transform_indices = @transform_3, window_bounds = array<i64: 1, 8, 32>}]} {
    %c0_i32 = arith.constant 0 : i32
    %0 = arith.cmpi eq, %arg1, %c0_i32 : i32
    %1 = arith.extui %0 : i1 to i32
    %c0_i32_0 = arith.constant 0 : i32
    %2 = arith.cmpi ne, %1, %c0_i32_0 : i32
    scf.if %2 {
      %cst_80 = arith.constant 0.000000e+00 : f32
      %271 = vector.broadcast %cst_80 : f32 to vector<1x32xf32>
      %c0_81 = arith.constant 0 : index
      %c0_82 = arith.constant 0 : index
      %272 = vector.load %arg6[%c0_81, %c0_82] : memref<1x32xf32, #tpu.memory_space<vmem>>, vector<1x32xf32>
      tpu.vector_store %arg6[%c0_81, %c0_82], %271 {strides = array<i32>} : memref<1x32xf32, #tpu.memory_space<vmem>>, vector<1x32xf32>,
    } else {
    }
    %c0 = arith.constant 0 : index
    %c0_1 = arith.constant 0 : index
    %3 = vector.load %arg3[%c0, %c0_1] : memref<32x96xf32, #tpu.memory_space<vmem>>, vector<32x96xf32>
    %c0_2 = arith.constant 0 : index
    %c0_3 = arith.constant 0 : index
    %4 = vector.load %arg4[%c0_2, %c0_3] : memref<1x32xf32, #tpu.memory_space<vmem>>, vector<1x32xf32>
    %c0_4 = arith.constant 0 : index
    %c0_5 = arith.constant 0 : index
    %5 = vector.load %arg6[%c0_4, %c0_5] : memref<1x32xf32, #tpu.memory_space<vmem>>, vector<1x32xf32>
    %cst = arith.constant dense<0.000000e+00> : vector<1x96xf32>
    %6 = tpu.matmul %5, %3, %cst {dimension_numbers = #tpu.dot_dimension_numbers<[1], [0], [0], [1], [0, 0, 1, 1], [], []>} : vector<1x32xf32>, vector<32x96xf32>, vector<1x96xf32> -> vector<1x96xf32>
    %c0_6 = arith.constant 0 : index
    %c0_7 = arith.constant 0 : index
    %c0_8 = arith.constant 0 : index
    %7 = vector.load %arg2[%c0_6, %c0_7, %c0_8] : memref<1x8x96xf32, #tpu.memory_space<vmem>>, vector<1x1x96xf32>
    %8 = vector.shape_cast %7 : vector<1x1x96xf32> to vector<1x96xf32>
    %9 = vector.extract_strided_slice %8 {offsets = [0, 0], sizes = [1, 32], strides = [1, 1]} : vector<1x96xf32> to vector<1x32xf32>
    %10 = vector.extract_strided_slice %6 {offsets = [0, 0], sizes = [1, 32], strides = [1, 1]} : vector<1x96xf32> to vector<1x32xf32>
    %11 = arith.addf %9, %10 : vector<1x32xf32>
    %12 = arith.negf %11 : vector<1x32xf32>
    %13 = math.exp %12 : vector<1x32xf32>
    %cst_9 = arith.constant 1.000000e+00 : f32
    %14 = vector.broadcast %cst_9 : f32 to vector<1x32xf32>
    %15 = arith.addf %14, %13 : vector<1x32xf32>
    %16 = arith.divf %14, %15 : vector<1x32xf32>
    %17 = vector.extract_strided_slice %8 {offsets = [0, 32], sizes = [1, 32], strides = [1, 1]} : vector<1x96xf32> to vector<1x32xf32>
    %18 = vector.extract_strided_slice %6 {offsets = [0, 32], sizes = [1, 32], strides = [1, 1]} : vector<1x96xf32> to vector<1x32xf32>
    %19 = arith.addf %17, %18 : vector<1x32xf32>
    %20 = arith.negf %19 : vector<1x32xf32>
    %21 = math.exp %20 : vector<1x32xf32>
    %cst_10 = arith.constant 1.000000e+00 : f32
    %22 = vector.broadcast %cst_10 : f32 to vector<1x32xf32>
    %23 = arith.addf %22, %21 : vector<1x32xf32>
    %24 = arith.divf %22, %23 : vector<1x32xf32>
    %25 = vector.extract_strided_slice %8 {offsets = [0, 64], sizes = [1, 32], strides = [1, 1]} : vector<1x96xf32> to vector<1x32xf32>
    %26 = vector.extract_strided_slice %6 {offsets = [0, 64], sizes = [1, 32], strides = [1, 1]} : vector<1x96xf32> to vector<1x32xf32>
    %27 = arith.addf %26, %4 : vector<1x32xf32>
    %28 = arith.mulf %16, %27 : vector<1x32xf32>
    %29 = arith.addf %25, %28 : vector<1x32xf32>
    %30 = math.tanh %29 : vector<1x32xf32>
    %cst_11 = arith.constant 1.000000e+00 : f32
    %31 = vector.broadcast %cst_11 : f32 to vector<1x32xf32>
    %32 = arith.subf %31, %24 : vector<1x32xf32>
    %33 = arith.mulf %32, %30 : vector<1x32xf32>
    %34 = arith.mulf %24, %5 : vector<1x32xf32>
    %35 = arith.addf %33, %34 : vector<1x32xf32>
    %c0_12 = arith.constant 0 : index
    %c0_13 = arith.constant 0 : index
    %c0_14 = arith.constant 0 : index
    %36 = vector.load %arg5[%c0_12, %c0_13, %c0_14] : memref<1x8x32xf32, #tpu.memory_space<vmem>>, vector<1x1x32xf32>
    %37 = vector.shape_cast %36 : vector<1x1x32xf32> to vector<1x32xf32>
    %38 = vector.shape_cast %35 : vector<1x32xf32> to vector<1x1x32xf32>
    tpu.vector_store %arg5[%c0_12, %c0_13, %c0_14], %38 {strides = array<i32>} : memref<1x8x32xf32, #tpu.memory_space<vmem>>, vector<1x1x32xf32>,
    %cst_15 = arith.constant dense<0.000000e+00> : vector<1x96xf32>
    %39 = tpu.matmul %35, %3, %cst_15 {dimension_numbers = #tpu.dot_dimension_numbers<[1], [0], [0], [1], [0, 0, 1, 1], [], []>} : vector<1x32xf32>, vector<32x96xf32>, vector<1x96xf32> -> vector<1x96xf32>
    %c0_16 = arith.constant 0 : index
    %c1 = arith.constant 1 : index
    %c0_17 = arith.constant 0 : index
    %40 = vector.load %arg2[%c0_16, %c1, %c0_17] : memref<1x8x96xf32, #tpu.memory_space<vmem>>, vector<1x1x96xf32>
    %41 = vector.shape_cast %40 : vector<1x1x96xf32> to vector<1x96xf32>
    %42 = vector.extract_strided_slice %41 {offsets = [0, 0], sizes = [1, 32], strides = [1, 1]} : vector<1x96xf32> to vector<1x32xf32>
    %43 = vector.extract_strided_slice %39 {offsets = [0, 0], sizes = [1, 32], strides = [1, 1]} : vector<1x96xf32> to vector<1x32xf32>
    %44 = arith.addf %42, %43 : vector<1x32xf32>
    %45 = arith.negf %44 : vector<1x32xf32>
    %46 = math.exp %45 : vector<1x32xf32>
    %cst_18 = arith.constant 1.000000e+00 : f32
    %47 = vector.broadcast %cst_18 : f32 to vector<1x32xf32>
    %48 = arith.addf %47, %46 : vector<1x32xf32>
    %49 = arith.divf %47, %48 : vector<1x32xf32>
    %50 = vector.extract_strided_slice %41 {offsets = [0, 32], sizes = [1, 32], strides = [1, 1]} : vector<1x96xf32> to vector<1x32xf32>
    %51 = vector.extract_strided_slice %39 {offsets = [0, 32], sizes = [1, 32], strides = [1, 1]} : vector<1x96xf32> to vector<1x32xf32>
    %52 = arith.addf %50, %51 : vector<1x32xf32>
    %53 = arith.negf %52 : vector<1x32xf32>
    %54 = math.exp %53 : vector<1x32xf32>
    %cst_19 = arith.constant 1.000000e+00 : f32
    %55 = vector.broadcast %cst_19 : f32 to vector<1x32xf32>
    %56 = arith.addf %55, %54 : vector<1x32xf32>
    %57 = arith.divf %55, %56 : vector<1x32xf32>
    %58 = vector.extract_strided_slice %41 {offsets = [0, 64], sizes = [1, 32], strides = [1, 1]} : vector<1x96xf32> to vector<1x32xf32>
    %59 = vector.extract_strided_slice %39 {offsets = [0, 64], sizes = [1, 32], strides = [1, 1]} : vector<1x96xf32> to vector<1x32xf32>
    %60 = arith.addf %59, %4 : vector<1x32xf32>
    %61 = arith.mulf %49, %60 : vector<1x32xf32>
    %62 = arith.addf %58, %61 : vector<1x32xf32>
    %63 = math.tanh %62 : vector<1x32xf32>
    %cst_20 = arith.constant 1.000000e+00 : f32
    %64 = vector.broadcast %cst_20 : f32 to vector<1x32xf32>
    %65 = arith.subf %64, %57 : vector<1x32xf32>
    %66 = arith.mulf %65, %63 : vector<1x32xf32>
    %67 = arith.mulf %57, %35 : vector<1x32xf32>
    %68 = arith.addf %66, %67 : vector<1x32xf32>
    %c0_21 = arith.constant 0 : index
    %c1_22 = arith.constant 1 : index
    %c0_23 = arith.constant 0 : index
    %69 = vector.load %arg5[%c0_21, %c1_22, %c0_23] : memref<1x8x32xf32, #tpu.memory_space<vmem>>, vector<1x1x32xf32>
    %70 = vector.shape_cast %69 : vector<1x1x32xf32> to vector<1x32xf32>
    %71 = vector.shape_cast %68 : vector<1x32xf32> to vector<1x1x32xf32>
    tpu.vector_store %arg5[%c0_21, %c1_22, %c0_23], %71 {strides = array<i32>} : memref<1x8x32xf32, #tpu.memory_space<vmem>>, vector<1x1x32xf32>,
    %cst_24 = arith.constant dense<0.000000e+00> : vector<1x96xf32>
    %72 = tpu.matmul %68, %3, %cst_24 {dimension_numbers = #tpu.dot_dimension_numbers<[1], [0], [0], [1], [0, 0, 1, 1], [], []>} : vector<1x32xf32>, vector<32x96xf32>, vector<1x96xf32> -> vector<1x96xf32>
    %c0_25 = arith.constant 0 : index
    %c2 = arith.constant 2 : index
    %c0_26 = arith.constant 0 : index
    %73 = vector.load %arg2[%c0_25, %c2, %c0_26] : memref<1x8x96xf32, #tpu.memory_space<vmem>>, vector<1x1x96xf32>
    %74 = vector.shape_cast %73 : vector<1x1x96xf32> to vector<1x96xf32>
    %75 = vector.extract_strided_slice %74 {offsets = [0, 0], sizes = [1, 32], strides = [1, 1]} : vector<1x96xf32> to vector<1x32xf32>
    %76 = vector.extract_strided_slice %72 {offsets = [0, 0], sizes = [1, 32], strides = [1, 1]} : vector<1x96xf32> to vector<1x32xf32>
    %77 = arith.addf %75, %76 : vector<1x32xf32>
    %78 = arith.negf %77 : vector<1x32xf32>
    %79 = math.exp %78 : vector<1x32xf32>
    %cst_27 = arith.constant 1.000000e+00 : f32
    %80 = vector.broadcast %cst_27 : f32 to vector<1x32xf32>
    %81 = arith.addf %80, %79 : vector<1x32xf32>
    %82 = arith.divf %80, %81 : vector<1x32xf32>
    %83 = vector.extract_strided_slice %74 {offsets = [0, 32], sizes = [1, 32], strides = [1, 1]} : vector<1x96xf32> to vector<1x32xf32>
    %84 = vector.extract_strided_slice %72 {offsets = [0, 32], sizes = [1, 32], strides = [1, 1]} : vector<1x96xf32> to vector<1x32xf32>
    %85 = arith.addf %83, %84 : vector<1x32xf32>
    %86 = arith.negf %85 : vector<1x32xf32>
    %87 = math.exp %86 : vector<1x32xf32>
    %cst_28 = arith.constant 1.000000e+00 : f32
    %88 = vector.broadcast %cst_28 : f32 to vector<1x32xf32>
    %89 = arith.addf %88, %87 : vector<1x32xf32>
    %90 = arith.divf %88, %89 : vector<1x32xf32>
    %91 = vector.extract_strided_slice %74 {offsets = [0, 64], sizes = [1, 32], strides = [1, 1]} : vector<1x96xf32> to vector<1x32xf32>
    %92 = vector.extract_strided_slice %72 {offsets = [0, 64], sizes = [1, 32], strides = [1, 1]} : vector<1x96xf32> to vector<1x32xf32>
    %93 = arith.addf %92, %4 : vector<1x32xf32>
    %94 = arith.mulf %82, %93 : vector<1x32xf32>
    %95 = arith.addf %91, %94 : vector<1x32xf32>
    %96 = math.tanh %95 : vector<1x32xf32>
    %cst_29 = arith.constant 1.000000e+00 : f32
    %97 = vector.broadcast %cst_29 : f32 to vector<1x32xf32>
    %98 = arith.subf %97, %90 : vector<1x32xf32>
    %99 = arith.mulf %98, %96 : vector<1x32xf32>
    %100 = arith.mulf %90, %68 : vector<1x32xf32>
    %101 = arith.addf %99, %100 : vector<1x32xf32>
    %c0_30 = arith.constant 0 : index
    %c2_31 = arith.constant 2 : index
    %c0_32 = arith.constant 0 : index
    %102 = vector.load %arg5[%c0_30, %c2_31, %c0_32] : memref<1x8x32xf32, #tpu.memory_space<vmem>>, vector<1x1x32xf32>
    %103 = vector.shape_cast %102 : vector<1x1x32xf32> to vector<1x32xf32>
    %104 = vector.shape_cast %101 : vector<1x32xf32> to vector<1x1x32xf32>
    tpu.vector_store %arg5[%c0_30, %c2_31, %c0_32], %104 {strides = array<i32>} : memref<1x8x32xf32, #tpu.memory_space<vmem>>, vector<1x1x32xf32>,
    %cst_33 = arith.constant dense<0.000000e+00> : vector<1x96xf32>
    %105 = tpu.matmul %101, %3, %cst_33 {dimension_numbers = #tpu.dot_dimension_numbers<[1], [0], [0], [1], [0, 0, 1, 1], [], []>} : vector<1x32xf32>, vector<32x96xf32>, vector<1x96xf32> -> vector<1x96xf32>
    %c0_34 = arith.constant 0 : index
    %c3 = arith.constant 3 : index
    %c0_35 = arith.constant 0 : index
    %106 = vector.load %arg2[%c0_34, %c3, %c0_35] : memref<1x8x96xf32, #tpu.memory_space<vmem>>, vector<1x1x96xf32>
    %107 = vector.shape_cast %106 : vector<1x1x96xf32> to vector<1x96xf32>
    %108 = vector.extract_strided_slice %107 {offsets = [0, 0], sizes = [1, 32], strides = [1, 1]} : vector<1x96xf32> to vector<1x32xf32>
    %109 = vector.extract_strided_slice %105 {offsets = [0, 0], sizes = [1, 32], strides = [1, 1]} : vector<1x96xf32> to vector<1x32xf32>
    %110 = arith.addf %108, %109 : vector<1x32xf32>
    %111 = arith.negf %110 : vector<1x32xf32>
    %112 = math.exp %111 : vector<1x32xf32>
    %cst_36 = arith.constant 1.000000e+00 : f32
    %113 = vector.broadcast %cst_36 : f32 to vector<1x32xf32>
    %114 = arith.addf %113, %112 : vector<1x32xf32>
    %115 = arith.divf %113, %114 : vector<1x32xf32>
    %116 = vector.extract_strided_slice %107 {offsets = [0, 32], sizes = [1, 32], strides = [1, 1]} : vector<1x96xf32> to vector<1x32xf32>
    %117 = vector.extract_strided_slice %105 {offsets = [0, 32], sizes = [1, 32], strides = [1, 1]} : vector<1x96xf32> to vector<1x32xf32>
    %118 = arith.addf %116, %117 : vector<1x32xf32>
    %119 = arith.negf %118 : vector<1x32xf32>
    %120 = math.exp %119 : vector<1x32xf32>
    %cst_37 = arith.constant 1.000000e+00 : f32
    %121 = vector.broadcast %cst_37 : f32 to vector<1x32xf32>
    %122 = arith.addf %121, %120 : vector<1x32xf32>
    %123 = arith.divf %121, %122 : vector<1x32xf32>
    %124 = vector.extract_strided_slice %107 {offsets = [0, 64], sizes = [1, 32], strides = [1, 1]} : vector<1x96xf32> to vector<1x32xf32>
    %125 = vector.extract_strided_slice %105 {offsets = [0, 64], sizes = [1, 32], strides = [1, 1]} : vector<1x96xf32> to vector<1x32xf32>
    %126 = arith.addf %125, %4 : vector<1x32xf32>
    %127 = arith.mulf %115, %126 : vector<1x32xf32>
    %128 = arith.addf %124, %127 : vector<1x32xf32>
    %129 = math.tanh %128 : vector<1x32xf32>
    %cst_38 = arith.constant 1.000000e+00 : f32
    %130 = vector.broadcast %cst_38 : f32 to vector<1x32xf32>
    %131 = arith.subf %130, %123 : vector<1x32xf32>
    %132 = arith.mulf %131, %129 : vector<1x32xf32>
    %133 = arith.mulf %123, %101 : vector<1x32xf32>
    %134 = arith.addf %132, %133 : vector<1x32xf32>
    %c0_39 = arith.constant 0 : index
    %c3_40 = arith.constant 3 : index
    %c0_41 = arith.constant 0 : index
    %135 = vector.load %arg5[%c0_39, %c3_40, %c0_41] : memref<1x8x32xf32, #tpu.memory_space<vmem>>, vector<1x1x32xf32>
    %136 = vector.shape_cast %135 : vector<1x1x32xf32> to vector<1x32xf32>
    %137 = vector.shape_cast %134 : vector<1x32xf32> to vector<1x1x32xf32>
    tpu.vector_store %arg5[%c0_39, %c3_40, %c0_41], %137 {strides = array<i32>} : memref<1x8x32xf32, #tpu.memory_space<vmem>>, vector<1x1x32xf32>,
    %cst_42 = arith.constant dense<0.000000e+00> : vector<1x96xf32>
    %138 = tpu.matmul %134, %3, %cst_42 {dimension_numbers = #tpu.dot_dimension_numbers<[1], [0], [0], [1], [0, 0, 1, 1], [], []>} : vector<1x32xf32>, vector<32x96xf32>, vector<1x96xf32> -> vector<1x96xf32>
    %c0_43 = arith.constant 0 : index
    %c4 = arith.constant 4 : index
    %c0_44 = arith.constant 0 : index
    %139 = vector.load %arg2[%c0_43, %c4, %c0_44] : memref<1x8x96xf32, #tpu.memory_space<vmem>>, vector<1x1x96xf32>
    %140 = vector.shape_cast %139 : vector<1x1x96xf32> to vector<1x96xf32>
    %141 = vector.extract_strided_slice %140 {offsets = [0, 0], sizes = [1, 32], strides = [1, 1]} : vector<1x96xf32> to vector<1x32xf32>
    %142 = vector.extract_strided_slice %138 {offsets = [0, 0], sizes = [1, 32], strides = [1, 1]} : vector<1x96xf32> to vector<1x32xf32>
    %143 = arith.addf %141, %142 : vector<1x32xf32>
    %144 = arith.negf %143 : vector<1x32xf32>
    %145 = math.exp %144 : vector<1x32xf32>
    %cst_45 = arith.constant 1.000000e+00 : f32
    %146 = vector.broadcast %cst_45 : f32 to vector<1x32xf32>
    %147 = arith.addf %146, %145 : vector<1x32xf32>
    %148 = arith.divf %146, %147 : vector<1x32xf32>
    %149 = vector.extract_strided_slice %140 {offsets = [0, 32], sizes = [1, 32], strides = [1, 1]} : vector<1x96xf32> to vector<1x32xf32>
    %150 = vector.extract_strided_slice %138 {offsets = [0, 32], sizes = [1, 32], strides = [1, 1]} : vector<1x96xf32> to vector<1x32xf32>
    %151 = arith.addf %149, %150 : vector<1x32xf32>
    %152 = arith.negf %151 : vector<1x32xf32>
    %153 = math.exp %152 : vector<1x32xf32>
    %cst_46 = arith.constant 1.000000e+00 : f32
    %154 = vector.broadcast %cst_46 : f32 to vector<1x32xf32>
    %155 = arith.addf %154, %153 : vector<1x32xf32>
    %156 = arith.divf %154, %155 : vector<1x32xf32>
    %157 = vector.extract_strided_slice %140 {offsets = [0, 64], sizes = [1, 32], strides = [1, 1]} : vector<1x96xf32> to vector<1x32xf32>
    %158 = vector.extract_strided_slice %138 {offsets = [0, 64], sizes = [1, 32], strides = [1, 1]} : vector<1x96xf32> to vector<1x32xf32>
    %159 = arith.addf %158, %4 : vector<1x32xf32>
    %160 = arith.mulf %148, %159 : vector<1x32xf32>
    %161 = arith.addf %157, %160 : vector<1x32xf32>
    %162 = math.tanh %161 : vector<1x32xf32>
    %cst_47 = arith.constant 1.000000e+00 : f32
    %163 = vector.broadcast %cst_47 : f32 to vector<1x32xf32>
    %164 = arith.subf %163, %156 : vector<1x32xf32>
    %165 = arith.mulf %164, %162 : vector<1x32xf32>
    %166 = arith.mulf %156, %134 : vector<1x32xf32>
    %167 = arith.addf %165, %166 : vector<1x32xf32>
    %c0_48 = arith.constant 0 : index
    %c4_49 = arith.constant 4 : index
    %c0_50 = arith.constant 0 : index
    %168 = vector.load %arg5[%c0_48, %c4_49, %c0_50] : memref<1x8x32xf32, #tpu.memory_space<vmem>>, vector<1x1x32xf32>
    %169 = vector.shape_cast %168 : vector<1x1x32xf32> to vector<1x32xf32>
    %170 = vector.shape_cast %167 : vector<1x32xf32> to vector<1x1x32xf32>
    tpu.vector_store %arg5[%c0_48, %c4_49, %c0_50], %170 {strides = array<i32>} : memref<1x8x32xf32, #tpu.memory_space<vmem>>, vector<1x1x32xf32>,
    %cst_51 = arith.constant dense<0.000000e+00> : vector<1x96xf32>
    %171 = tpu.matmul %167, %3, %cst_51 {dimension_numbers = #tpu.dot_dimension_numbers<[1], [0], [0], [1], [0, 0, 1, 1], [], []>} : vector<1x32xf32>, vector<32x96xf32>, vector<1x96xf32> -> vector<1x96xf32>
    %c0_52 = arith.constant 0 : index
    %c5 = arith.constant 5 : index
    %c0_53 = arith.constant 0 : index
    %172 = vector.load %arg2[%c0_52, %c5, %c0_53] : memref<1x8x96xf32, #tpu.memory_space<vmem>>, vector<1x1x96xf32>
    %173 = vector.shape_cast %172 : vector<1x1x96xf32> to vector<1x96xf32>
    %174 = vector.extract_strided_slice %173 {offsets = [0, 0], sizes = [1, 32], strides = [1, 1]} : vector<1x96xf32> to vector<1x32xf32>
    %175 = vector.extract_strided_slice %171 {offsets = [0, 0], sizes = [1, 32], strides = [1, 1]} : vector<1x96xf32> to vector<1x32xf32>
    %176 = arith.addf %174, %175 : vector<1x32xf32>
    %177 = arith.negf %176 : vector<1x32xf32>
    %178 = math.exp %177 : vector<1x32xf32>
    %cst_54 = arith.constant 1.000000e+00 : f32
    %179 = vector.broadcast %cst_54 : f32 to vector<1x32xf32>
    %180 = arith.addf %179, %178 : vector<1x32xf32>
    %181 = arith.divf %179, %180 : vector<1x32xf32>
    %182 = vector.extract_strided_slice %173 {offsets = [0, 32], sizes = [1, 32], strides = [1, 1]} : vector<1x96xf32> to vector<1x32xf32>
    %183 = vector.extract_strided_slice %171 {offsets = [0, 32], sizes = [1, 32], strides = [1, 1]} : vector<1x96xf32> to vector<1x32xf32>
    %184 = arith.addf %182, %183 : vector<1x32xf32>
    %185 = arith.negf %184 : vector<1x32xf32>
    %186 = math.exp %185 : vector<1x32xf32>
    %cst_55 = arith.constant 1.000000e+00 : f32
    %187 = vector.broadcast %cst_55 : f32 to vector<1x32xf32>
    %188 = arith.addf %187, %186 : vector<1x32xf32>
    %189 = arith.divf %187, %188 : vector<1x32xf32>
    %190 = vector.extract_strided_slice %173 {offsets = [0, 64], sizes = [1, 32], strides = [1, 1]} : vector<1x96xf32> to vector<1x32xf32>
    %191 = vector.extract_strided_slice %171 {offsets = [0, 64], sizes = [1, 32], strides = [1, 1]} : vector<1x96xf32> to vector<1x32xf32>
    %192 = arith.addf %191, %4 : vector<1x32xf32>
    %193 = arith.mulf %181, %192 : vector<1x32xf32>
    %194 = arith.addf %190, %193 : vector<1x32xf32>
    %195 = math.tanh %194 : vector<1x32xf32>
    %cst_56 = arith.constant 1.000000e+00 : f32
    %196 = vector.broadcast %cst_56 : f32 to vector<1x32xf32>
    %197 = arith.subf %196, %189 : vector<1x32xf32>
    %198 = arith.mulf %197, %195 : vector<1x32xf32>
    %199 = arith.mulf %189, %167 : vector<1x32xf32>
    %200 = arith.addf %198, %199 : vector<1x32xf32>
    %c0_57 = arith.constant 0 : index
    %c5_58 = arith.constant 5 : index
    %c0_59 = arith.constant 0 : index
    %201 = vector.load %arg5[%c0_57, %c5_58, %c0_59] : memref<1x8x32xf32, #tpu.memory_space<vmem>>, vector<1x1x32xf32>
    %202 = vector.shape_cast %201 : vector<1x1x32xf32> to vector<1x32xf32>
    %203 = vector.shape_cast %200 : vector<1x32xf32> to vector<1x1x32xf32>
    tpu.vector_store %arg5[%c0_57, %c5_58, %c0_59], %203 {strides = array<i32>} : memref<1x8x32xf32, #tpu.memory_space<vmem>>, vector<1x1x32xf32>,
    %cst_60 = arith.constant dense<0.000000e+00> : vector<1x96xf32>
    %204 = tpu.matmul %200, %3, %cst_60 {dimension_numbers = #tpu.dot_dimension_numbers<[1], [0], [0], [1], [0, 0, 1, 1], [], []>} : vector<1x32xf32>, vector<32x96xf32>, vector<1x96xf32> -> vector<1x96xf32>
    %c0_61 = arith.constant 0 : index
    %c6 = arith.constant 6 : index
    %c0_62 = arith.constant 0 : index
    %205 = vector.load %arg2[%c0_61, %c6, %c0_62] : memref<1x8x96xf32, #tpu.memory_space<vmem>>, vector<1x1x96xf32>
    %206 = vector.shape_cast %205 : vector<1x1x96xf32> to vector<1x96xf32>
    %207 = vector.extract_strided_slice %206 {offsets = [0, 0], sizes = [1, 32], strides = [1, 1]} : vector<1x96xf32> to vector<1x32xf32>
    %208 = vector.extract_strided_slice %204 {offsets = [0, 0], sizes = [1, 32], strides = [1, 1]} : vector<1x96xf32> to vector<1x32xf32>
    %209 = arith.addf %207, %208 : vector<1x32xf32>
    %210 = arith.negf %209 : vector<1x32xf32>
    %211 = math.exp %210 : vector<1x32xf32>
    %cst_63 = arith.constant 1.000000e+00 : f32
    %212 = vector.broadcast %cst_63 : f32 to vector<1x32xf32>
    %213 = arith.addf %212, %211 : vector<1x32xf32>
    %214 = arith.divf %212, %213 : vector<1x32xf32>
    %215 = vector.extract_strided_slice %206 {offsets = [0, 32], sizes = [1, 32], strides = [1, 1]} : vector<1x96xf32> to vector<1x32xf32>
    %216 = vector.extract_strided_slice %204 {offsets = [0, 32], sizes = [1, 32], strides = [1, 1]} : vector<1x96xf32> to vector<1x32xf32>
    %217 = arith.addf %215, %216 : vector<1x32xf32>
    %218 = arith.negf %217 : vector<1x32xf32>
    %219 = math.exp %218 : vector<1x32xf32>
    %cst_64 = arith.constant 1.000000e+00 : f32
    %220 = vector.broadcast %cst_64 : f32 to vector<1x32xf32>
    %221 = arith.addf %220, %219 : vector<1x32xf32>
    %222 = arith.divf %220, %221 : vector<1x32xf32>
    %223 = vector.extract_strided_slice %206 {offsets = [0, 64], sizes = [1, 32], strides = [1, 1]} : vector<1x96xf32> to vector<1x32xf32>
    %224 = vector.extract_strided_slice %204 {offsets = [0, 64], sizes = [1, 32], strides = [1, 1]} : vector<1x96xf32> to vector<1x32xf32>
    %225 = arith.addf %224, %4 : vector<1x32xf32>
    %226 = arith.mulf %214, %225 : vector<1x32xf32>
    %227 = arith.addf %223, %226 : vector<1x32xf32>
    %228 = math.tanh %227 : vector<1x32xf32>
    %cst_65 = arith.constant 1.000000e+00 : f32
    %229 = vector.broadcast %cst_65 : f32 to vector<1x32xf32>
    %230 = arith.subf %229, %222 : vector<1x32xf32>
    %231 = arith.mulf %230, %228 : vector<1x32xf32>
    %232 = arith.mulf %222, %200 : vector<1x32xf32>
    %233 = arith.addf %231, %232 : vector<1x32xf32>
    %c0_66 = arith.constant 0 : index
    %c6_67 = arith.constant 6 : index
    %c0_68 = arith.constant 0 : index
    %234 = vector.load %arg5[%c0_66, %c6_67, %c0_68] : memref<1x8x32xf32, #tpu.memory_space<vmem>>, vector<1x1x32xf32>
    %235 = vector.shape_cast %234 : vector<1x1x32xf32> to vector<1x32xf32>
    %236 = vector.shape_cast %233 : vector<1x32xf32> to vector<1x1x32xf32>
    tpu.vector_store %arg5[%c0_66, %c6_67, %c0_68], %236 {strides = array<i32>} : memref<1x8x32xf32, #tpu.memory_space<vmem>>, vector<1x1x32xf32>,
    %cst_69 = arith.constant dense<0.000000e+00> : vector<1x96xf32>
    %237 = tpu.matmul %233, %3, %cst_69 {dimension_numbers = #tpu.dot_dimension_numbers<[1], [0], [0], [1], [0, 0, 1, 1], [], []>} : vector<1x32xf32>, vector<32x96xf32>, vector<1x96xf32> -> vector<1x96xf32>
    %c0_70 = arith.constant 0 : index
    %c7 = arith.constant 7 : index
    %c0_71 = arith.constant 0 : index
    %238 = vector.load %arg2[%c0_70, %c7, %c0_71] : memref<1x8x96xf32, #tpu.memory_space<vmem>>, vector<1x1x96xf32>
    %239 = vector.shape_cast %238 : vector<1x1x96xf32> to vector<1x96xf32>
    %240 = vector.extract_strided_slice %239 {offsets = [0, 0], sizes = [1, 32], strides = [1, 1]} : vector<1x96xf32> to vector<1x32xf32>
    %241 = vector.extract_strided_slice %237 {offsets = [0, 0], sizes = [1, 32], strides = [1, 1]} : vector<1x96xf32> to vector<1x32xf32>
    %242 = arith.addf %240, %241 : vector<1x32xf32>
    %243 = arith.negf %242 : vector<1x32xf32>
    %244 = math.exp %243 : vector<1x32xf32>
    %cst_72 = arith.constant 1.000000e+00 : f32
    %245 = vector.broadcast %cst_72 : f32 to vector<1x32xf32>
    %246 = arith.addf %245, %244 : vector<1x32xf32>
    %247 = arith.divf %245, %246 : vector<1x32xf32>
    %248 = vector.extract_strided_slice %239 {offsets = [0, 32], sizes = [1, 32], strides = [1, 1]} : vector<1x96xf32> to vector<1x32xf32>
    %249 = vector.extract_strided_slice %237 {offsets = [0, 32], sizes = [1, 32], strides = [1, 1]} : vector<1x96xf32> to vector<1x32xf32>
    %250 = arith.addf %248, %249 : vector<1x32xf32>
    %251 = arith.negf %250 : vector<1x32xf32>
    %252 = math.exp %251 : vector<1x32xf32>
    %cst_73 = arith.constant 1.000000e+00 : f32
    %253 = vector.broadcast %cst_73 : f32 to vector<1x32xf32>
    %254 = arith.addf %253, %252 : vector<1x32xf32>
    %255 = arith.divf %253, %254 : vector<1x32xf32>
    %256 = vector.extract_strided_slice %239 {offsets = [0, 64], sizes = [1, 32], strides = [1, 1]} : vector<1x96xf32> to vector<1x32xf32>
    %257 = vector.extract_strided_slice %237 {offsets = [0, 64], sizes = [1, 32], strides = [1, 1]} : vector<1x96xf32> to vector<1x32xf32>
    %258 = arith.addf %257, %4 : vector<1x32xf32>
    %259 = arith.mulf %247, %258 : vector<1x32xf32>
    %260 = arith.addf %256, %259 : vector<1x32xf32>
    %261 = math.tanh %260 : vector<1x32xf32>
    %cst_74 = arith.constant 1.000000e+00 : f32
    %262 = vector.broadcast %cst_74 : f32 to vector<1x32xf32>
    %263 = arith.subf %262, %255 : vector<1x32xf32>
    %264 = arith.mulf %263, %261 : vector<1x32xf32>
    %265 = arith.mulf %255, %233 : vector<1x32xf32>
    %266 = arith.addf %264, %265 : vector<1x32xf32>
    %c0_75 = arith.constant 0 : index
    %c7_76 = arith.constant 7 : index
    %c0_77 = arith.constant 0 : index
    %267 = vector.load %arg5[%c0_75, %c7_76, %c0_77] : memref<1x8x32xf32, #tpu.memory_space<vmem>>, vector<1x1x32xf32>
    %268 = vector.shape_cast %267 : vector<1x1x32xf32> to vector<1x32xf32>
    %269 = vector.shape_cast %266 : vector<1x32xf32> to vector<1x1x32xf32>
    tpu.vector_store %arg5[%c0_75, %c7_76, %c0_77], %269 {strides = array<i32>} : memref<1x8x32xf32, #tpu.memory_space<vmem>>, vector<1x1x32xf32>,
    %c0_78 = arith.constant 0 : index
    %c0_79 = arith.constant 0 : index
    %270 = vector.load %arg6[%c0_78, %c0_79] : memref<1x32xf32, #tpu.memory_space<vmem>>, vector<1x32xf32>
    tpu.vector_store %arg6[%c0_78, %c0_79], %266 {strides = array<i32>} : memref<1x32xf32, #tpu.memory_space<vmem>>, vector<1x32xf32>,
    return
  }
  func.func @transform_0(%arg0: i32, %arg1: i32) -> (i32, i32, i32) {
    %c0_i32 = arith.constant 0 : i32
    %c0_i32_0 = arith.constant 0 : i32
    return %arg0, %arg1, %c0_i32 : i32, i32, i32
  }
  func.func @transform_1(%arg0: i32, %arg1: i32) -> (i32, i32) {
    %c0_i32 = arith.constant 0 : i32
    %c0_i32_0 = arith.constant 0 : i32
    %c0_i32_1 = arith.constant 0 : i32
    return %c0_i32, %c0_i32_0 : i32, i32
  }
  func.func @transform_2(%arg0: i32, %arg1: i32) -> (i32, i32) {
    %c0_i32 = arith.constant 0 : i32
    %c0_i32_0 = arith.constant 0 : i32
    %c0_i32_1 = arith.constant 0 : i32
    return %c0_i32, %c0_i32_0 : i32, i32
  }
  func.func @transform_3(%arg0: i32, %arg1: i32) -> (i32, i32, i32) {
    %c0_i32 = arith.constant 0 : i32
    %c0_i32_0 = arith.constant 0 : i32
    return %arg0, %arg1, %c0_i32 : i32, i32, i32
  }
}

module attributes {stable_mosaic.version = 11 : i64} {
  func.func @_dense_kernel(%arg0: i32, %arg1: i32, %arg2: memref<16x32xf32, #tpu.memory_space<vmem>>, %arg3: memref<32x96xf32, #tpu.memory_space<vmem>>, %arg4: memref<1x96xf32, #tpu.memory_space<vmem>>, %arg5: memref<16x96xf32, #tpu.memory_space<vmem>>) attributes {dimension_semantics = [#tpu.dimension_semantics<parallel>, #tpu.dimension_semantics<parallel>], iteration_bounds = array<i64: 1, 1>, scalar_prefetch = 0 : i64, scratch_operands = 0 : i64, tpu.core_type = #tpu.core_type<tc>, window_params = [{transform_indices = @transform_0, window_bounds = array<i64: 16, 32>}, {transform_indices = @transform_1, window_bounds = array<i64: 32, 96>}, {transform_indices = @transform_2, window_bounds = array<i64: 1, 96>}, {transform_indices = @transform_3, window_bounds = array<i64: 16, 96>}]} {
    %c0 = arith.constant 0 : index
    %c0_0 = arith.constant 0 : index
    %0 = vector.load %arg2[%c0, %c0_0] : memref<16x32xf32, #tpu.memory_space<vmem>>, vector<16x32xf32>
    %c0_1 = arith.constant 0 : index
    %c0_2 = arith.constant 0 : index
    %1 = vector.load %arg3[%c0_1, %c0_2] : memref<32x96xf32, #tpu.memory_space<vmem>>, vector<32x96xf32>
    %cst = arith.constant dense<0.000000e+00> : vector<16x96xf32>
    %2 = tpu.matmul %0, %1, %cst {dimension_numbers = #tpu.dot_dimension_numbers<[1], [0], [0], [1], [0, 0, 1, 1], [], []>} : vector<16x32xf32>, vector<32x96xf32>, vector<16x96xf32> -> vector<16x96xf32>
    %c0_3 = arith.constant 0 : index
    %c0_4 = arith.constant 0 : index
    %3 = vector.load %arg4[%c0_3, %c0_4] : memref<1x96xf32, #tpu.memory_space<vmem>>, vector<1x96xf32>
    %4 = vector.broadcast %3 : vector<1x96xf32> to vector<16x96xf32>
    %5 = arith.addf %2, %4 : vector<16x96xf32>
    %c0_5 = arith.constant 0 : index
    %c0_6 = arith.constant 0 : index
    %6 = vector.load %arg5[%c0_5, %c0_6] : memref<16x96xf32, #tpu.memory_space<vmem>>, vector<16x96xf32>
    tpu.vector_store %arg5[%c0_5, %c0_6], %5 {strides = array<i32>} : memref<16x96xf32, #tpu.memory_space<vmem>>, vector<16x96xf32>,
    return
  }
  func.func @transform_0(%arg0: i32, %arg1: i32) -> (i32, i32) {
    %c0_i32 = arith.constant 0 : i32
    %c0_i32_0 = arith.constant 0 : i32
    return %arg0, %c0_i32 : i32, i32
  }
  func.func @transform_1(%arg0: i32, %arg1: i32) -> (i32, i32) {
    %c0_i32 = arith.constant 0 : i32
    %c0_i32_0 = arith.constant 0 : i32
    return %c0_i32, %arg1 : i32, i32
  }
  func.func @transform_2(%arg0: i32, %arg1: i32) -> (i32, i32) {
    %c0_i32 = arith.constant 0 : i32
    %c0_i32_0 = arith.constant 0 : i32
    return %c0_i32, %arg1 : i32, i32
  }
  func.func @transform_3(%arg0: i32, %arg1: i32) -> (i32, i32) {
    %c0_i32 = arith.constant 0 : i32
    return %arg0, %arg1 : i32, i32
  }
}

module attributes {stable_mosaic.version = 11 : i64} {
  func.func @_dense_kernel(%arg0: i32, %arg1: i32, %arg2: memref<16x32xf32, #tpu.memory_space<vmem>>, %arg3: memref<32x128xf32, #tpu.memory_space<vmem>>, %arg4: memref<1x128xf32, #tpu.memory_space<vmem>>, %arg5: memref<16x128xf32, #tpu.memory_space<vmem>>) attributes {dimension_semantics = [#tpu.dimension_semantics<parallel>, #tpu.dimension_semantics<parallel>], iteration_bounds = array<i64: 1, 1>, scalar_prefetch = 0 : i64, scratch_operands = 0 : i64, tpu.core_type = #tpu.core_type<tc>, window_params = [{transform_indices = @transform_0, window_bounds = array<i64: 16, 32>}, {transform_indices = @transform_1, window_bounds = array<i64: 32, 128>}, {transform_indices = @transform_2, window_bounds = array<i64: 1, 128>}, {transform_indices = @transform_3, window_bounds = array<i64: 16, 128>}]} {
    %c0 = arith.constant 0 : index
    %c0_0 = arith.constant 0 : index
    %0 = vector.load %arg2[%c0, %c0_0] : memref<16x32xf32, #tpu.memory_space<vmem>>, vector<16x32xf32>
    %c0_1 = arith.constant 0 : index
    %c0_2 = arith.constant 0 : index
    %1 = vector.load %arg3[%c0_1, %c0_2] : memref<32x128xf32, #tpu.memory_space<vmem>>, vector<32x128xf32>
    %cst = arith.constant dense<0.000000e+00> : vector<16x128xf32>
    %2 = tpu.matmul %0, %1, %cst {dimension_numbers = #tpu.dot_dimension_numbers<[1], [0], [0], [1], [0, 0, 1, 1], [], []>} : vector<16x32xf32>, vector<32x128xf32>, vector<16x128xf32> -> vector<16x128xf32>
    %c0_3 = arith.constant 0 : index
    %c0_4 = arith.constant 0 : index
    %3 = vector.load %arg4[%c0_3, %c0_4] : memref<1x128xf32, #tpu.memory_space<vmem>>, vector<1x128xf32>
    %4 = vector.broadcast %3 : vector<1x128xf32> to vector<16x128xf32>
    %5 = arith.addf %2, %4 : vector<16x128xf32>
    %c0_5 = arith.constant 0 : index
    %c0_6 = arith.constant 0 : index
    %6 = vector.load %arg5[%c0_5, %c0_6] : memref<16x128xf32, #tpu.memory_space<vmem>>, vector<16x128xf32>
    tpu.vector_store %arg5[%c0_5, %c0_6], %5 {strides = array<i32>} : memref<16x128xf32, #tpu.memory_space<vmem>>, vector<16x128xf32>,
    return
  }
  func.func @transform_0(%arg0: i32, %arg1: i32) -> (i32, i32) {
    %c0_i32 = arith.constant 0 : i32
    %c0_i32_0 = arith.constant 0 : i32
    return %arg0, %c0_i32 : i32, i32
  }
  func.func @transform_1(%arg0: i32, %arg1: i32) -> (i32, i32) {
    %c0_i32 = arith.constant 0 : i32
    %c0_i32_0 = arith.constant 0 : i32
    return %c0_i32, %arg1 : i32, i32
  }
  func.func @transform_2(%arg0: i32, %arg1: i32) -> (i32, i32) {
    %c0_i32 = arith.constant 0 : i32
    %c0_i32_0 = arith.constant 0 : i32
    return %c0_i32, %arg1 : i32, i32
  }
  func.func @transform_3(%arg0: i32, %arg1: i32) -> (i32, i32) {
    %c0_i32 = arith.constant 0 : i32
    return %arg0, %arg1 : i32, i32
  }
}

module attributes {stable_mosaic.version = 11 : i64} {
  func.func @_gru_kernel(%arg0: i32, %arg1: i32, %arg2: memref<1x8x96xf32, #tpu.memory_space<vmem>>, %arg3: memref<32x96xf32, #tpu.memory_space<vmem>>, %arg4: memref<1x32xf32, #tpu.memory_space<vmem>>, %arg5: memref<1x8x32xf32, #tpu.memory_space<vmem>>, %arg6: memref<1x32xf32, #tpu.memory_space<vmem>>) attributes {dimension_semantics = [#tpu.dimension_semantics<parallel>, #tpu.dimension_semantics<arbitrary>], iteration_bounds = array<i64: 2, 1>, scalar_prefetch = 0 : i64, scratch_operands = 1 : i64, tpu.core_type = #tpu.core_type<tc>, window_params = [{transform_indices = @transform_0, window_bounds = array<i64: 1, 8, 96>}, {pipeline_mode = #tpu.pipeline_mode<synchronous>, transform_indices = @transform_1, window_bounds = array<i64: 32, 96>}, {pipeline_mode = #tpu.pipeline_mode<synchronous>, transform_indices = @transform_2, window_bounds = array<i64: 1, 32>}, {transform_indices = @transform_3, window_bounds = array<i64: 1, 8, 32>}]} {
    %c0_i32 = arith.constant 0 : i32
    %0 = arith.cmpi eq, %arg1, %c0_i32 : i32
    %1 = arith.extui %0 : i1 to i32
    %c0_i32_0 = arith.constant 0 : i32
    %2 = arith.cmpi ne, %1, %c0_i32_0 : i32
    scf.if %2 {
      %cst_80 = arith.constant 0.000000e+00 : f32
      %271 = vector.broadcast %cst_80 : f32 to vector<1x32xf32>
      %c0_81 = arith.constant 0 : index
      %c0_82 = arith.constant 0 : index
      %272 = vector.load %arg6[%c0_81, %c0_82] : memref<1x32xf32, #tpu.memory_space<vmem>>, vector<1x32xf32>
      tpu.vector_store %arg6[%c0_81, %c0_82], %271 {strides = array<i32>} : memref<1x32xf32, #tpu.memory_space<vmem>>, vector<1x32xf32>,
    } else {
    }
    %c0 = arith.constant 0 : index
    %c0_1 = arith.constant 0 : index
    %3 = vector.load %arg3[%c0, %c0_1] : memref<32x96xf32, #tpu.memory_space<vmem>>, vector<32x96xf32>
    %c0_2 = arith.constant 0 : index
    %c0_3 = arith.constant 0 : index
    %4 = vector.load %arg4[%c0_2, %c0_3] : memref<1x32xf32, #tpu.memory_space<vmem>>, vector<1x32xf32>
    %c0_4 = arith.constant 0 : index
    %c0_5 = arith.constant 0 : index
    %5 = vector.load %arg6[%c0_4, %c0_5] : memref<1x32xf32, #tpu.memory_space<vmem>>, vector<1x32xf32>
    %cst = arith.constant dense<0.000000e+00> : vector<1x96xf32>
    %6 = tpu.matmul %5, %3, %cst {dimension_numbers = #tpu.dot_dimension_numbers<[1], [0], [0], [1], [0, 0, 1, 1], [], []>} : vector<1x32xf32>, vector<32x96xf32>, vector<1x96xf32> -> vector<1x96xf32>
    %c0_6 = arith.constant 0 : index
    %c0_7 = arith.constant 0 : index
    %c0_8 = arith.constant 0 : index
    %7 = vector.load %arg2[%c0_6, %c0_7, %c0_8] : memref<1x8x96xf32, #tpu.memory_space<vmem>>, vector<1x1x96xf32>
    %8 = vector.shape_cast %7 : vector<1x1x96xf32> to vector<1x96xf32>
    %9 = vector.extract_strided_slice %8 {offsets = [0, 0], sizes = [1, 32], strides = [1, 1]} : vector<1x96xf32> to vector<1x32xf32>
    %10 = vector.extract_strided_slice %6 {offsets = [0, 0], sizes = [1, 32], strides = [1, 1]} : vector<1x96xf32> to vector<1x32xf32>
    %11 = arith.addf %9, %10 : vector<1x32xf32>
    %12 = arith.negf %11 : vector<1x32xf32>
    %13 = math.exp %12 : vector<1x32xf32>
    %cst_9 = arith.constant 1.000000e+00 : f32
    %14 = vector.broadcast %cst_9 : f32 to vector<1x32xf32>
    %15 = arith.addf %14, %13 : vector<1x32xf32>
    %16 = arith.divf %14, %15 : vector<1x32xf32>
    %17 = vector.extract_strided_slice %8 {offsets = [0, 32], sizes = [1, 32], strides = [1, 1]} : vector<1x96xf32> to vector<1x32xf32>
    %18 = vector.extract_strided_slice %6 {offsets = [0, 32], sizes = [1, 32], strides = [1, 1]} : vector<1x96xf32> to vector<1x32xf32>
    %19 = arith.addf %17, %18 : vector<1x32xf32>
    %20 = arith.negf %19 : vector<1x32xf32>
    %21 = math.exp %20 : vector<1x32xf32>
    %cst_10 = arith.constant 1.000000e+00 : f32
    %22 = vector.broadcast %cst_10 : f32 to vector<1x32xf32>
    %23 = arith.addf %22, %21 : vector<1x32xf32>
    %24 = arith.divf %22, %23 : vector<1x32xf32>
    %25 = vector.extract_strided_slice %8 {offsets = [0, 64], sizes = [1, 32], strides = [1, 1]} : vector<1x96xf32> to vector<1x32xf32>
    %26 = vector.extract_strided_slice %6 {offsets = [0, 64], sizes = [1, 32], strides = [1, 1]} : vector<1x96xf32> to vector<1x32xf32>
    %27 = arith.addf %26, %4 : vector<1x32xf32>
    %28 = arith.mulf %16, %27 : vector<1x32xf32>
    %29 = arith.addf %25, %28 : vector<1x32xf32>
    %30 = math.tanh %29 : vector<1x32xf32>
    %cst_11 = arith.constant 1.000000e+00 : f32
    %31 = vector.broadcast %cst_11 : f32 to vector<1x32xf32>
    %32 = arith.subf %31, %24 : vector<1x32xf32>
    %33 = arith.mulf %32, %30 : vector<1x32xf32>
    %34 = arith.mulf %24, %5 : vector<1x32xf32>
    %35 = arith.addf %33, %34 : vector<1x32xf32>
    %c0_12 = arith.constant 0 : index
    %c0_13 = arith.constant 0 : index
    %c0_14 = arith.constant 0 : index
    %36 = vector.load %arg5[%c0_12, %c0_13, %c0_14] : memref<1x8x32xf32, #tpu.memory_space<vmem>>, vector<1x1x32xf32>
    %37 = vector.shape_cast %36 : vector<1x1x32xf32> to vector<1x32xf32>
    %38 = vector.shape_cast %35 : vector<1x32xf32> to vector<1x1x32xf32>
    tpu.vector_store %arg5[%c0_12, %c0_13, %c0_14], %38 {strides = array<i32>} : memref<1x8x32xf32, #tpu.memory_space<vmem>>, vector<1x1x32xf32>,
    %cst_15 = arith.constant dense<0.000000e+00> : vector<1x96xf32>
    %39 = tpu.matmul %35, %3, %cst_15 {dimension_numbers = #tpu.dot_dimension_numbers<[1], [0], [0], [1], [0, 0, 1, 1], [], []>} : vector<1x32xf32>, vector<32x96xf32>, vector<1x96xf32> -> vector<1x96xf32>
    %c0_16 = arith.constant 0 : index
    %c1 = arith.constant 1 : index
    %c0_17 = arith.constant 0 : index
    %40 = vector.load %arg2[%c0_16, %c1, %c0_17] : memref<1x8x96xf32, #tpu.memory_space<vmem>>, vector<1x1x96xf32>
    %41 = vector.shape_cast %40 : vector<1x1x96xf32> to vector<1x96xf32>
    %42 = vector.extract_strided_slice %41 {offsets = [0, 0], sizes = [1, 32], strides = [1, 1]} : vector<1x96xf32> to vector<1x32xf32>
    %43 = vector.extract_strided_slice %39 {offsets = [0, 0], sizes = [1, 32], strides = [1, 1]} : vector<1x96xf32> to vector<1x32xf32>
    %44 = arith.addf %42, %43 : vector<1x32xf32>
    %45 = arith.negf %44 : vector<1x32xf32>
    %46 = math.exp %45 : vector<1x32xf32>
    %cst_18 = arith.constant 1.000000e+00 : f32
    %47 = vector.broadcast %cst_18 : f32 to vector<1x32xf32>
    %48 = arith.addf %47, %46 : vector<1x32xf32>
    %49 = arith.divf %47, %48 : vector<1x32xf32>
    %50 = vector.extract_strided_slice %41 {offsets = [0, 32], sizes = [1, 32], strides = [1, 1]} : vector<1x96xf32> to vector<1x32xf32>
    %51 = vector.extract_strided_slice %39 {offsets = [0, 32], sizes = [1, 32], strides = [1, 1]} : vector<1x96xf32> to vector<1x32xf32>
    %52 = arith.addf %50, %51 : vector<1x32xf32>
    %53 = arith.negf %52 : vector<1x32xf32>
    %54 = math.exp %53 : vector<1x32xf32>
    %cst_19 = arith.constant 1.000000e+00 : f32
    %55 = vector.broadcast %cst_19 : f32 to vector<1x32xf32>
    %56 = arith.addf %55, %54 : vector<1x32xf32>
    %57 = arith.divf %55, %56 : vector<1x32xf32>
    %58 = vector.extract_strided_slice %41 {offsets = [0, 64], sizes = [1, 32], strides = [1, 1]} : vector<1x96xf32> to vector<1x32xf32>
    %59 = vector.extract_strided_slice %39 {offsets = [0, 64], sizes = [1, 32], strides = [1, 1]} : vector<1x96xf32> to vector<1x32xf32>
    %60 = arith.addf %59, %4 : vector<1x32xf32>
    %61 = arith.mulf %49, %60 : vector<1x32xf32>
    %62 = arith.addf %58, %61 : vector<1x32xf32>
    %63 = math.tanh %62 : vector<1x32xf32>
    %cst_20 = arith.constant 1.000000e+00 : f32
    %64 = vector.broadcast %cst_20 : f32 to vector<1x32xf32>
    %65 = arith.subf %64, %57 : vector<1x32xf32>
    %66 = arith.mulf %65, %63 : vector<1x32xf32>
    %67 = arith.mulf %57, %35 : vector<1x32xf32>
    %68 = arith.addf %66, %67 : vector<1x32xf32>
    %c0_21 = arith.constant 0 : index
    %c1_22 = arith.constant 1 : index
    %c0_23 = arith.constant 0 : index
    %69 = vector.load %arg5[%c0_21, %c1_22, %c0_23] : memref<1x8x32xf32, #tpu.memory_space<vmem>>, vector<1x1x32xf32>
    %70 = vector.shape_cast %69 : vector<1x1x32xf32> to vector<1x32xf32>
    %71 = vector.shape_cast %68 : vector<1x32xf32> to vector<1x1x32xf32>
    tpu.vector_store %arg5[%c0_21, %c1_22, %c0_23], %71 {strides = array<i32>} : memref<1x8x32xf32, #tpu.memory_space<vmem>>, vector<1x1x32xf32>,
    %cst_24 = arith.constant dense<0.000000e+00> : vector<1x96xf32>
    %72 = tpu.matmul %68, %3, %cst_24 {dimension_numbers = #tpu.dot_dimension_numbers<[1], [0], [0], [1], [0, 0, 1, 1], [], []>} : vector<1x32xf32>, vector<32x96xf32>, vector<1x96xf32> -> vector<1x96xf32>
    %c0_25 = arith.constant 0 : index
    %c2 = arith.constant 2 : index
    %c0_26 = arith.constant 0 : index
    %73 = vector.load %arg2[%c0_25, %c2, %c0_26] : memref<1x8x96xf32, #tpu.memory_space<vmem>>, vector<1x1x96xf32>
    %74 = vector.shape_cast %73 : vector<1x1x96xf32> to vector<1x96xf32>
    %75 = vector.extract_strided_slice %74 {offsets = [0, 0], sizes = [1, 32], strides = [1, 1]} : vector<1x96xf32> to vector<1x32xf32>
    %76 = vector.extract_strided_slice %72 {offsets = [0, 0], sizes = [1, 32], strides = [1, 1]} : vector<1x96xf32> to vector<1x32xf32>
    %77 = arith.addf %75, %76 : vector<1x32xf32>
    %78 = arith.negf %77 : vector<1x32xf32>
    %79 = math.exp %78 : vector<1x32xf32>
    %cst_27 = arith.constant 1.000000e+00 : f32
    %80 = vector.broadcast %cst_27 : f32 to vector<1x32xf32>
    %81 = arith.addf %80, %79 : vector<1x32xf32>
    %82 = arith.divf %80, %81 : vector<1x32xf32>
    %83 = vector.extract_strided_slice %74 {offsets = [0, 32], sizes = [1, 32], strides = [1, 1]} : vector<1x96xf32> to vector<1x32xf32>
    %84 = vector.extract_strided_slice %72 {offsets = [0, 32], sizes = [1, 32], strides = [1, 1]} : vector<1x96xf32> to vector<1x32xf32>
    %85 = arith.addf %83, %84 : vector<1x32xf32>
    %86 = arith.negf %85 : vector<1x32xf32>
    %87 = math.exp %86 : vector<1x32xf32>
    %cst_28 = arith.constant 1.000000e+00 : f32
    %88 = vector.broadcast %cst_28 : f32 to vector<1x32xf32>
    %89 = arith.addf %88, %87 : vector<1x32xf32>
    %90 = arith.divf %88, %89 : vector<1x32xf32>
    %91 = vector.extract_strided_slice %74 {offsets = [0, 64], sizes = [1, 32], strides = [1, 1]} : vector<1x96xf32> to vector<1x32xf32>
    %92 = vector.extract_strided_slice %72 {offsets = [0, 64], sizes = [1, 32], strides = [1, 1]} : vector<1x96xf32> to vector<1x32xf32>
    %93 = arith.addf %92, %4 : vector<1x32xf32>
    %94 = arith.mulf %82, %93 : vector<1x32xf32>
    %95 = arith.addf %91, %94 : vector<1x32xf32>
    %96 = math.tanh %95 : vector<1x32xf32>
    %cst_29 = arith.constant 1.000000e+00 : f32
    %97 = vector.broadcast %cst_29 : f32 to vector<1x32xf32>
    %98 = arith.subf %97, %90 : vector<1x32xf32>
    %99 = arith.mulf %98, %96 : vector<1x32xf32>
    %100 = arith.mulf %90, %68 : vector<1x32xf32>
    %101 = arith.addf %99, %100 : vector<1x32xf32>
    %c0_30 = arith.constant 0 : index
    %c2_31 = arith.constant 2 : index
    %c0_32 = arith.constant 0 : index
    %102 = vector.load %arg5[%c0_30, %c2_31, %c0_32] : memref<1x8x32xf32, #tpu.memory_space<vmem>>, vector<1x1x32xf32>
    %103 = vector.shape_cast %102 : vector<1x1x32xf32> to vector<1x32xf32>
    %104 = vector.shape_cast %101 : vector<1x32xf32> to vector<1x1x32xf32>
    tpu.vector_store %arg5[%c0_30, %c2_31, %c0_32], %104 {strides = array<i32>} : memref<1x8x32xf32, #tpu.memory_space<vmem>>, vector<1x1x32xf32>,
    %cst_33 = arith.constant dense<0.000000e+00> : vector<1x96xf32>
    %105 = tpu.matmul %101, %3, %cst_33 {dimension_numbers = #tpu.dot_dimension_numbers<[1], [0], [0], [1], [0, 0, 1, 1], [], []>} : vector<1x32xf32>, vector<32x96xf32>, vector<1x96xf32> -> vector<1x96xf32>
    %c0_34 = arith.constant 0 : index
    %c3 = arith.constant 3 : index
    %c0_35 = arith.constant 0 : index
    %106 = vector.load %arg2[%c0_34, %c3, %c0_35] : memref<1x8x96xf32, #tpu.memory_space<vmem>>, vector<1x1x96xf32>
    %107 = vector.shape_cast %106 : vector<1x1x96xf32> to vector<1x96xf32>
    %108 = vector.extract_strided_slice %107 {offsets = [0, 0], sizes = [1, 32], strides = [1, 1]} : vector<1x96xf32> to vector<1x32xf32>
    %109 = vector.extract_strided_slice %105 {offsets = [0, 0], sizes = [1, 32], strides = [1, 1]} : vector<1x96xf32> to vector<1x32xf32>
    %110 = arith.addf %108, %109 : vector<1x32xf32>
    %111 = arith.negf %110 : vector<1x32xf32>
    %112 = math.exp %111 : vector<1x32xf32>
    %cst_36 = arith.constant 1.000000e+00 : f32
    %113 = vector.broadcast %cst_36 : f32 to vector<1x32xf32>
    %114 = arith.addf %113, %112 : vector<1x32xf32>
    %115 = arith.divf %113, %114 : vector<1x32xf32>
    %116 = vector.extract_strided_slice %107 {offsets = [0, 32], sizes = [1, 32], strides = [1, 1]} : vector<1x96xf32> to vector<1x32xf32>
    %117 = vector.extract_strided_slice %105 {offsets = [0, 32], sizes = [1, 32], strides = [1, 1]} : vector<1x96xf32> to vector<1x32xf32>
    %118 = arith.addf %116, %117 : vector<1x32xf32>
    %119 = arith.negf %118 : vector<1x32xf32>
    %120 = math.exp %119 : vector<1x32xf32>
    %cst_37 = arith.constant 1.000000e+00 : f32
    %121 = vector.broadcast %cst_37 : f32 to vector<1x32xf32>
    %122 = arith.addf %121, %120 : vector<1x32xf32>
    %123 = arith.divf %121, %122 : vector<1x32xf32>
    %124 = vector.extract_strided_slice %107 {offsets = [0, 64], sizes = [1, 32], strides = [1, 1]} : vector<1x96xf32> to vector<1x32xf32>
    %125 = vector.extract_strided_slice %105 {offsets = [0, 64], sizes = [1, 32], strides = [1, 1]} : vector<1x96xf32> to vector<1x32xf32>
    %126 = arith.addf %125, %4 : vector<1x32xf32>
    %127 = arith.mulf %115, %126 : vector<1x32xf32>
    %128 = arith.addf %124, %127 : vector<1x32xf32>
    %129 = math.tanh %128 : vector<1x32xf32>
    %cst_38 = arith.constant 1.000000e+00 : f32
    %130 = vector.broadcast %cst_38 : f32 to vector<1x32xf32>
    %131 = arith.subf %130, %123 : vector<1x32xf32>
    %132 = arith.mulf %131, %129 : vector<1x32xf32>
    %133 = arith.mulf %123, %101 : vector<1x32xf32>
    %134 = arith.addf %132, %133 : vector<1x32xf32>
    %c0_39 = arith.constant 0 : index
    %c3_40 = arith.constant 3 : index
    %c0_41 = arith.constant 0 : index
    %135 = vector.load %arg5[%c0_39, %c3_40, %c0_41] : memref<1x8x32xf32, #tpu.memory_space<vmem>>, vector<1x1x32xf32>
    %136 = vector.shape_cast %135 : vector<1x1x32xf32> to vector<1x32xf32>
    %137 = vector.shape_cast %134 : vector<1x32xf32> to vector<1x1x32xf32>
    tpu.vector_store %arg5[%c0_39, %c3_40, %c0_41], %137 {strides = array<i32>} : memref<1x8x32xf32, #tpu.memory_space<vmem>>, vector<1x1x32xf32>,
    %cst_42 = arith.constant dense<0.000000e+00> : vector<1x96xf32>
    %138 = tpu.matmul %134, %3, %cst_42 {dimension_numbers = #tpu.dot_dimension_numbers<[1], [0], [0], [1], [0, 0, 1, 1], [], []>} : vector<1x32xf32>, vector<32x96xf32>, vector<1x96xf32> -> vector<1x96xf32>
    %c0_43 = arith.constant 0 : index
    %c4 = arith.constant 4 : index
    %c0_44 = arith.constant 0 : index
    %139 = vector.load %arg2[%c0_43, %c4, %c0_44] : memref<1x8x96xf32, #tpu.memory_space<vmem>>, vector<1x1x96xf32>
    %140 = vector.shape_cast %139 : vector<1x1x96xf32> to vector<1x96xf32>
    %141 = vector.extract_strided_slice %140 {offsets = [0, 0], sizes = [1, 32], strides = [1, 1]} : vector<1x96xf32> to vector<1x32xf32>
    %142 = vector.extract_strided_slice %138 {offsets = [0, 0], sizes = [1, 32], strides = [1, 1]} : vector<1x96xf32> to vector<1x32xf32>
    %143 = arith.addf %141, %142 : vector<1x32xf32>
    %144 = arith.negf %143 : vector<1x32xf32>
    %145 = math.exp %144 : vector<1x32xf32>
    %cst_45 = arith.constant 1.000000e+00 : f32
    %146 = vector.broadcast %cst_45 : f32 to vector<1x32xf32>
    %147 = arith.addf %146, %145 : vector<1x32xf32>
    %148 = arith.divf %146, %147 : vector<1x32xf32>
    %149 = vector.extract_strided_slice %140 {offsets = [0, 32], sizes = [1, 32], strides = [1, 1]} : vector<1x96xf32> to vector<1x32xf32>
    %150 = vector.extract_strided_slice %138 {offsets = [0, 32], sizes = [1, 32], strides = [1, 1]} : vector<1x96xf32> to vector<1x32xf32>
    %151 = arith.addf %149, %150 : vector<1x32xf32>
    %152 = arith.negf %151 : vector<1x32xf32>
    %153 = math.exp %152 : vector<1x32xf32>
    %cst_46 = arith.constant 1.000000e+00 : f32
    %154 = vector.broadcast %cst_46 : f32 to vector<1x32xf32>
    %155 = arith.addf %154, %153 : vector<1x32xf32>
    %156 = arith.divf %154, %155 : vector<1x32xf32>
    %157 = vector.extract_strided_slice %140 {offsets = [0, 64], sizes = [1, 32], strides = [1, 1]} : vector<1x96xf32> to vector<1x32xf32>
    %158 = vector.extract_strided_slice %138 {offsets = [0, 64], sizes = [1, 32], strides = [1, 1]} : vector<1x96xf32> to vector<1x32xf32>
    %159 = arith.addf %158, %4 : vector<1x32xf32>
    %160 = arith.mulf %148, %159 : vector<1x32xf32>
    %161 = arith.addf %157, %160 : vector<1x32xf32>
    %162 = math.tanh %161 : vector<1x32xf32>
    %cst_47 = arith.constant 1.000000e+00 : f32
    %163 = vector.broadcast %cst_47 : f32 to vector<1x32xf32>
    %164 = arith.subf %163, %156 : vector<1x32xf32>
    %165 = arith.mulf %164, %162 : vector<1x32xf32>
    %166 = arith.mulf %156, %134 : vector<1x32xf32>
    %167 = arith.addf %165, %166 : vector<1x32xf32>
    %c0_48 = arith.constant 0 : index
    %c4_49 = arith.constant 4 : index
    %c0_50 = arith.constant 0 : index
    %168 = vector.load %arg5[%c0_48, %c4_49, %c0_50] : memref<1x8x32xf32, #tpu.memory_space<vmem>>, vector<1x1x32xf32>
    %169 = vector.shape_cast %168 : vector<1x1x32xf32> to vector<1x32xf32>
    %170 = vector.shape_cast %167 : vector<1x32xf32> to vector<1x1x32xf32>
    tpu.vector_store %arg5[%c0_48, %c4_49, %c0_50], %170 {strides = array<i32>} : memref<1x8x32xf32, #tpu.memory_space<vmem>>, vector<1x1x32xf32>,
    %cst_51 = arith.constant dense<0.000000e+00> : vector<1x96xf32>
    %171 = tpu.matmul %167, %3, %cst_51 {dimension_numbers = #tpu.dot_dimension_numbers<[1], [0], [0], [1], [0, 0, 1, 1], [], []>} : vector<1x32xf32>, vector<32x96xf32>, vector<1x96xf32> -> vector<1x96xf32>
    %c0_52 = arith.constant 0 : index
    %c5 = arith.constant 5 : index
    %c0_53 = arith.constant 0 : index
    %172 = vector.load %arg2[%c0_52, %c5, %c0_53] : memref<1x8x96xf32, #tpu.memory_space<vmem>>, vector<1x1x96xf32>
    %173 = vector.shape_cast %172 : vector<1x1x96xf32> to vector<1x96xf32>
    %174 = vector.extract_strided_slice %173 {offsets = [0, 0], sizes = [1, 32], strides = [1, 1]} : vector<1x96xf32> to vector<1x32xf32>
    %175 = vector.extract_strided_slice %171 {offsets = [0, 0], sizes = [1, 32], strides = [1, 1]} : vector<1x96xf32> to vector<1x32xf32>
    %176 = arith.addf %174, %175 : vector<1x32xf32>
    %177 = arith.negf %176 : vector<1x32xf32>
    %178 = math.exp %177 : vector<1x32xf32>
    %cst_54 = arith.constant 1.000000e+00 : f32
    %179 = vector.broadcast %cst_54 : f32 to vector<1x32xf32>
    %180 = arith.addf %179, %178 : vector<1x32xf32>
    %181 = arith.divf %179, %180 : vector<1x32xf32>
    %182 = vector.extract_strided_slice %173 {offsets = [0, 32], sizes = [1, 32], strides = [1, 1]} : vector<1x96xf32> to vector<1x32xf32>
    %183 = vector.extract_strided_slice %171 {offsets = [0, 32], sizes = [1, 32], strides = [1, 1]} : vector<1x96xf32> to vector<1x32xf32>
    %184 = arith.addf %182, %183 : vector<1x32xf32>
    %185 = arith.negf %184 : vector<1x32xf32>
    %186 = math.exp %185 : vector<1x32xf32>
    %cst_55 = arith.constant 1.000000e+00 : f32
    %187 = vector.broadcast %cst_55 : f32 to vector<1x32xf32>
    %188 = arith.addf %187, %186 : vector<1x32xf32>
    %189 = arith.divf %187, %188 : vector<1x32xf32>
    %190 = vector.extract_strided_slice %173 {offsets = [0, 64], sizes = [1, 32], strides = [1, 1]} : vector<1x96xf32> to vector<1x32xf32>
    %191 = vector.extract_strided_slice %171 {offsets = [0, 64], sizes = [1, 32], strides = [1, 1]} : vector<1x96xf32> to vector<1x32xf32>
    %192 = arith.addf %191, %4 : vector<1x32xf32>
    %193 = arith.mulf %181, %192 : vector<1x32xf32>
    %194 = arith.addf %190, %193 : vector<1x32xf32>
    %195 = math.tanh %194 : vector<1x32xf32>
    %cst_56 = arith.constant 1.000000e+00 : f32
    %196 = vector.broadcast %cst_56 : f32 to vector<1x32xf32>
    %197 = arith.subf %196, %189 : vector<1x32xf32>
    %198 = arith.mulf %197, %195 : vector<1x32xf32>
    %199 = arith.mulf %189, %167 : vector<1x32xf32>
    %200 = arith.addf %198, %199 : vector<1x32xf32>
    %c0_57 = arith.constant 0 : index
    %c5_58 = arith.constant 5 : index
    %c0_59 = arith.constant 0 : index
    %201 = vector.load %arg5[%c0_57, %c5_58, %c0_59] : memref<1x8x32xf32, #tpu.memory_space<vmem>>, vector<1x1x32xf32>
    %202 = vector.shape_cast %201 : vector<1x1x32xf32> to vector<1x32xf32>
    %203 = vector.shape_cast %200 : vector<1x32xf32> to vector<1x1x32xf32>
    tpu.vector_store %arg5[%c0_57, %c5_58, %c0_59], %203 {strides = array<i32>} : memref<1x8x32xf32, #tpu.memory_space<vmem>>, vector<1x1x32xf32>,
    %cst_60 = arith.constant dense<0.000000e+00> : vector<1x96xf32>
    %204 = tpu.matmul %200, %3, %cst_60 {dimension_numbers = #tpu.dot_dimension_numbers<[1], [0], [0], [1], [0, 0, 1, 1], [], []>} : vector<1x32xf32>, vector<32x96xf32>, vector<1x96xf32> -> vector<1x96xf32>
    %c0_61 = arith.constant 0 : index
    %c6 = arith.constant 6 : index
    %c0_62 = arith.constant 0 : index
    %205 = vector.load %arg2[%c0_61, %c6, %c0_62] : memref<1x8x96xf32, #tpu.memory_space<vmem>>, vector<1x1x96xf32>
    %206 = vector.shape_cast %205 : vector<1x1x96xf32> to vector<1x96xf32>
    %207 = vector.extract_strided_slice %206 {offsets = [0, 0], sizes = [1, 32], strides = [1, 1]} : vector<1x96xf32> to vector<1x32xf32>
    %208 = vector.extract_strided_slice %204 {offsets = [0, 0], sizes = [1, 32], strides = [1, 1]} : vector<1x96xf32> to vector<1x32xf32>
    %209 = arith.addf %207, %208 : vector<1x32xf32>
    %210 = arith.negf %209 : vector<1x32xf32>
    %211 = math.exp %210 : vector<1x32xf32>
    %cst_63 = arith.constant 1.000000e+00 : f32
    %212 = vector.broadcast %cst_63 : f32 to vector<1x32xf32>
    %213 = arith.addf %212, %211 : vector<1x32xf32>
    %214 = arith.divf %212, %213 : vector<1x32xf32>
    %215 = vector.extract_strided_slice %206 {offsets = [0, 32], sizes = [1, 32], strides = [1, 1]} : vector<1x96xf32> to vector<1x32xf32>
    %216 = vector.extract_strided_slice %204 {offsets = [0, 32], sizes = [1, 32], strides = [1, 1]} : vector<1x96xf32> to vector<1x32xf32>
    %217 = arith.addf %215, %216 : vector<1x32xf32>
    %218 = arith.negf %217 : vector<1x32xf32>
    %219 = math.exp %218 : vector<1x32xf32>
    %cst_64 = arith.constant 1.000000e+00 : f32
    %220 = vector.broadcast %cst_64 : f32 to vector<1x32xf32>
    %221 = arith.addf %220, %219 : vector<1x32xf32>
    %222 = arith.divf %220, %221 : vector<1x32xf32>
    %223 = vector.extract_strided_slice %206 {offsets = [0, 64], sizes = [1, 32], strides = [1, 1]} : vector<1x96xf32> to vector<1x32xf32>
    %224 = vector.extract_strided_slice %204 {offsets = [0, 64], sizes = [1, 32], strides = [1, 1]} : vector<1x96xf32> to vector<1x32xf32>
    %225 = arith.addf %224, %4 : vector<1x32xf32>
    %226 = arith.mulf %214, %225 : vector<1x32xf32>
    %227 = arith.addf %223, %226 : vector<1x32xf32>
    %228 = math.tanh %227 : vector<1x32xf32>
    %cst_65 = arith.constant 1.000000e+00 : f32
    %229 = vector.broadcast %cst_65 : f32 to vector<1x32xf32>
    %230 = arith.subf %229, %222 : vector<1x32xf32>
    %231 = arith.mulf %230, %228 : vector<1x32xf32>
    %232 = arith.mulf %222, %200 : vector<1x32xf32>
    %233 = arith.addf %231, %232 : vector<1x32xf32>
    %c0_66 = arith.constant 0 : index
    %c6_67 = arith.constant 6 : index
    %c0_68 = arith.constant 0 : index
    %234 = vector.load %arg5[%c0_66, %c6_67, %c0_68] : memref<1x8x32xf32, #tpu.memory_space<vmem>>, vector<1x1x32xf32>
    %235 = vector.shape_cast %234 : vector<1x1x32xf32> to vector<1x32xf32>
    %236 = vector.shape_cast %233 : vector<1x32xf32> to vector<1x1x32xf32>
    tpu.vector_store %arg5[%c0_66, %c6_67, %c0_68], %236 {strides = array<i32>} : memref<1x8x32xf32, #tpu.memory_space<vmem>>, vector<1x1x32xf32>,
    %cst_69 = arith.constant dense<0.000000e+00> : vector<1x96xf32>
    %237 = tpu.matmul %233, %3, %cst_69 {dimension_numbers = #tpu.dot_dimension_numbers<[1], [0], [0], [1], [0, 0, 1, 1], [], []>} : vector<1x32xf32>, vector<32x96xf32>, vector<1x96xf32> -> vector<1x96xf32>
    %c0_70 = arith.constant 0 : index
    %c7 = arith.constant 7 : index
    %c0_71 = arith.constant 0 : index
    %238 = vector.load %arg2[%c0_70, %c7, %c0_71] : memref<1x8x96xf32, #tpu.memory_space<vmem>>, vector<1x1x96xf32>
    %239 = vector.shape_cast %238 : vector<1x1x96xf32> to vector<1x96xf32>
    %240 = vector.extract_strided_slice %239 {offsets = [0, 0], sizes = [1, 32], strides = [1, 1]} : vector<1x96xf32> to vector<1x32xf32>
    %241 = vector.extract_strided_slice %237 {offsets = [0, 0], sizes = [1, 32], strides = [1, 1]} : vector<1x96xf32> to vector<1x32xf32>
    %242 = arith.addf %240, %241 : vector<1x32xf32>
    %243 = arith.negf %242 : vector<1x32xf32>
    %244 = math.exp %243 : vector<1x32xf32>
    %cst_72 = arith.constant 1.000000e+00 : f32
    %245 = vector.broadcast %cst_72 : f32 to vector<1x32xf32>
    %246 = arith.addf %245, %244 : vector<1x32xf32>
    %247 = arith.divf %245, %246 : vector<1x32xf32>
    %248 = vector.extract_strided_slice %239 {offsets = [0, 32], sizes = [1, 32], strides = [1, 1]} : vector<1x96xf32> to vector<1x32xf32>
    %249 = vector.extract_strided_slice %237 {offsets = [0, 32], sizes = [1, 32], strides = [1, 1]} : vector<1x96xf32> to vector<1x32xf32>
    %250 = arith.addf %248, %249 : vector<1x32xf32>
    %251 = arith.negf %250 : vector<1x32xf32>
    %252 = math.exp %251 : vector<1x32xf32>
    %cst_73 = arith.constant 1.000000e+00 : f32
    %253 = vector.broadcast %cst_73 : f32 to vector<1x32xf32>
    %254 = arith.addf %253, %252 : vector<1x32xf32>
    %255 = arith.divf %253, %254 : vector<1x32xf32>
    %256 = vector.extract_strided_slice %239 {offsets = [0, 64], sizes = [1, 32], strides = [1, 1]} : vector<1x96xf32> to vector<1x32xf32>
    %257 = vector.extract_strided_slice %237 {offsets = [0, 64], sizes = [1, 32], strides = [1, 1]} : vector<1x96xf32> to vector<1x32xf32>
    %258 = arith.addf %257, %4 : vector<1x32xf32>
    %259 = arith.mulf %247, %258 : vector<1x32xf32>
    %260 = arith.addf %256, %259 : vector<1x32xf32>
    %261 = math.tanh %260 : vector<1x32xf32>
    %cst_74 = arith.constant 1.000000e+00 : f32
    %262 = vector.broadcast %cst_74 : f32 to vector<1x32xf32>
    %263 = arith.subf %262, %255 : vector<1x32xf32>
    %264 = arith.mulf %263, %261 : vector<1x32xf32>
    %265 = arith.mulf %255, %233 : vector<1x32xf32>
    %266 = arith.addf %264, %265 : vector<1x32xf32>
    %c0_75 = arith.constant 0 : index
    %c7_76 = arith.constant 7 : index
    %c0_77 = arith.constant 0 : index
    %267 = vector.load %arg5[%c0_75, %c7_76, %c0_77] : memref<1x8x32xf32, #tpu.memory_space<vmem>>, vector<1x1x32xf32>
    %268 = vector.shape_cast %267 : vector<1x1x32xf32> to vector<1x32xf32>
    %269 = vector.shape_cast %266 : vector<1x32xf32> to vector<1x1x32xf32>
    tpu.vector_store %arg5[%c0_75, %c7_76, %c0_77], %269 {strides = array<i32>} : memref<1x8x32xf32, #tpu.memory_space<vmem>>, vector<1x1x32xf32>,
    %c0_78 = arith.constant 0 : index
    %c0_79 = arith.constant 0 : index
    %270 = vector.load %arg6[%c0_78, %c0_79] : memref<1x32xf32, #tpu.memory_space<vmem>>, vector<1x32xf32>
    tpu.vector_store %arg6[%c0_78, %c0_79], %266 {strides = array<i32>} : memref<1x32xf32, #tpu.memory_space<vmem>>, vector<1x32xf32>,
    return
  }
  func.func @transform_0(%arg0: i32, %arg1: i32) -> (i32, i32, i32) {
    %c0_i32 = arith.constant 0 : i32
    %c0_i32_0 = arith.constant 0 : i32
    return %arg0, %arg1, %c0_i32 : i32, i32, i32
  }
  func.func @transform_1(%arg0: i32, %arg1: i32) -> (i32, i32) {
    %c0_i32 = arith.constant 0 : i32
    %c0_i32_0 = arith.constant 0 : i32
    %c0_i32_1 = arith.constant 0 : i32
    return %c0_i32, %c0_i32_0 : i32, i32
  }
  func.func @transform_2(%arg0: i32, %arg1: i32) -> (i32, i32) {
    %c0_i32 = arith.constant 0 : i32
    %c0_i32_0 = arith.constant 0 : i32
    %c0_i32_1 = arith.constant 0 : i32
    return %c0_i32, %c0_i32_0 : i32, i32
  }
  func.func @transform_3(%arg0: i32, %arg1: i32) -> (i32, i32, i32) {
    %c0_i32 = arith.constant 0 : i32
    %c0_i32_0 = arith.constant 0 : i32
    return %arg0, %arg1, %c0_i32 : i32, i32, i32
  }
}

</mosaic_0001>

<bundles_post_ra>
// kernel: language_model_forward.5
= control target key start
LH: loop header
LB: loop body
LE: loop exit
PB: predicated region body
PF: predicated region fallthrough
CT: control target
= control target key end

     0   :  { %s158_s0 = inlined_call_operand.vmem [shape: f32[16,32], index: 0, kind: input, shape index: {}]   ;;  %s159_s1 = inlined_call_operand.vmem [shape: f32[32,128], index: 1, kind: input, shape index: {}]   ;;  %s160_s2 = inlined_call_operand.vmem [shape: f32[1,128], index: 2, kind: input, shape index: {}]   ;;  %s161_s3 = inlined_call_operand.hbm [shape: f32[16,128], index: 3, kind: output, shape index: {}]  }
   0x1   :  { %v20_v0 = vld [vmem:[%s159_s1 + $0x18] sm:$0xff]  ;;  %v19_v1 = vld [vmem:[%s159_s1 + $0x10] sm:$0xff]  ;;  %v18_v2 = vld [vmem:[%s159_s1 + $0x8] sm:$0xff] }
   0x2   :  { %44 = vmatpush.msra.mxu0 %v20_v0  ;;  %77 = vmatpush.msra.mxu1 %v20_v0 }
   0x3   :  { %8 = vsyncpa [#allocation3], 0  ;;  %v17_v3 = vld [vmem:[%s159_s1] sm:$0xff]  ;;  %vm25_vm0 = vcmask 261120   ;;  %v16_v5 = vld [vmem:[%s158_s0 + $0x8] sm:$0xff]  ;;  %s111_s1 = smov [#allocation2]  }
   0x4   :  { %45 = vmatpush.msra.mxu0 %v19_v1  ;;  %78 = vmatpush.msra.mxu1 %v19_v1  ;;  %v15_v4 = vld [vmem:[%s158_s0] sm:$0xff]  ;;  %s61_s26 = sshll.u32 %s111_s1, 4  ;;  %s63_s29 = sshll.u32 %s161_s3, 4  ;;  %s62_s26 = int_to_ptr.vmem [resolvable:$true] %s61_s26  ;;  %s64_s29 = int_to_ptr.hbm [resolvable:$true] %s63_s29 }
   0x5   :  { %v84_v6 = vld [vmem:[%s160_s2] ss:$0 sm:$0xff]  ;;  %s112_s0 = smov 128   ;;  %s113_s30 = smov 8  }
   0x6   :  { %46 = vmatpush.msra.mxu0 %v18_v2  ;;  %79 = vmatpush.msra.mxu1 %v18_v2 }
   0x8   :  { %47 = vmatpush.msra.mxu0 %v17_v3  ;;  %80 = vmatpush.msra.mxu1 %v17_v3 }
   0x9   :  { %75 = vmatmul.msk.f32.vlgmr.msra.gmra.mxu0 %vm25_vm0, %v15_v4  ;;  %76 = vmatmul.msk.f32.vlgmr.msra.gmra.mxu1 %vm25_vm0, %v16_v5 }
  0x86   :  { %v49_v7 = vpop.f32.mrf.mxu0  ;;  %v52_v8 = vpop.f32.mrf.mxu1 }
  0x87   :  { %v50_v9 = vadd.f32 %v84_v6, %v49_v7  ;;  %v53_v10 = vadd.f32 %v84_v6, %v52_v8 }
  0x89   :  { %55 = vst [vmem:[#allocation2] sm:$0xff] %v50_v9 }
  0x8a   :  { %56 = vst [vmem:[#allocation2 + $0x8] sm:$0xff] %v53_v10 }
  0x8b   :  { %69 = dma.vmem_to_hbm [thread:$0]  %s62_s26, 256, %s64_s29, [#allocation3], %s112_s0, %s112_s0, %s113_s30  }
  0x8c   :  { %109 = dma.done.wait [#allocation3], 256  }
  0x8d   :  { %110 = vsyncadd [#allocation3], 4294967040 }
  0x8e   :  { %74 = vsyncpa [#allocation3], 1 }

// kernel: language_model_forward.3
= control target key start
LH: loop header
LB: loop body
LE: loop exit
PB: predicated region body
PF: predicated region fallthrough
CT: control target
= control target key end

     0   :  { %vm24_vm0 = vcmask 261120   ;;  %vm54_vm1 = vcmask 785408   ;;  %s115_s1 = inlined_call_operand.vmem [shape: f32[32,96], index: 1, kind: input, shape index: {}]   ;;  %s116_s2 = inlined_call_operand.vmem [shape: f32[1,96], index: 2, kind: input, shape index: {}]   ;;  %s117_s0 = inlined_call_operand.vmem [shape: f32[16,32], index: 0, kind: input, shape index: {}]   ;;  %s118_s3 = inlined_call_operand.vmem [shape: f32[16,96], index: 3, kind: output, shape index: {}]  }
   0x1   :  { %v19_v0 = vld [vmem:[%s115_s1 + $0x18] sm:$0xff]  ;;  %v18_v1 = vld [vmem:[%s115_s1 + $0x10] sm:$0xff]  ;;  %v17_v2 = vld [vmem:[%s115_s1 + $0x8] sm:$0xff] }
   0x2   :  { %43 = vmatpush.msra.mxu0 %v19_v0  ;;  %63 = vmatpush.msra.mxu1 %v19_v0  ;;  %v16_v3 = vld [vmem:[%s115_s1] sm:$0xff]  ;;  %v15_v5 = vld [vmem:[%s117_s0 + $0x8] sm:$0xff] }
   0x3   :  { %v14_v4 = vld [vmem:[%s117_s0] sm:$0xff] }
   0x4   :  { %44 = vmatpush.msra.mxu0 %v18_v1  ;;  %64 = vmatpush.msra.mxu1 %v18_v1  ;;  %v67_v6 = vld [vmem:[%s116_s2] ss:$0 sm:$0xff] }
   0x6   :  { %45 = vmatpush.msra.mxu0 %v17_v2  ;;  %65 = vmatpush.msra.mxu1 %v17_v2 }
   0x8   :  { %46 = vmatpush.msra.mxu0 %v16_v3  ;;  %66 = vmatpush.msra.mxu1 %v16_v3 }
   0x9   :  { %61 = vmatmul.msk.f32.vlgmr.msra.gmra.mxu0 %vm24_vm0, %v14_v4  ;;  %62 = vmatmul.msk.f32.vlgmr.msra.gmra.mxu1 %vm24_vm0, %v15_v5 }
  0x86   :  { %v48_v7 = vpop.f32.mrf.mxu0  ;;  %v51_v8 = vpop.f32.mrf.mxu1 }
  0x87   :  { %v49_v9 = vadd.f32 %v67_v6, %v48_v7  ;;  %v52_v10 = vadd.f32 %v67_v6, %v51_v8 }
  0x89   :  { %55 = vst.msk [vmem:[%s118_s3] sm:$0xff] %vm54_vm1, %v49_v9 }
  0x8a   :  { %56 = vst.msk [vmem:[%s118_s3 + $0x8] sm:$0xff] %vm54_vm1, %v52_v10 }

// kernel: language_model_forward.4
= control target key start
LH: loop header
LB: loop body
LE: loop exit
PB: predicated region body
PF: predicated region fallthrough
CT: control target
= control target key end

     0   :  { %s991_s12 = smov 0   ;;  %s993_s13 = smov 0   ;;  %s1131_s0 = inlined_call_operand.vmem [shape: f32[2,8,96], index: 0, kind: input, shape index: {}]   ;;  %s1132_s1 = inlined_call_operand.vmem [shape: f32[32,96], index: 1, kind: input, shape index: {}]   ;;  %s1133_s2 = inlined_call_operand.vmem [shape: f32[1,32], index: 2, kind: input, shape index: {}]   ;;  %s1134_s3 = inlined_call_operand.vmem [shape: f32[2,8,32], index: 3, kind: output, shape index: {}]  }
   0x1   :  { %s995_s14 = smov 0  }
   0x2 LB: > { %s25_s15 = sadd.s32 1, %s961_s13  ;;  %p844_p0 = scmp.ge.s32.totalorder %s965_s14, 1  ;;  %s965_s14 = sphi %s995_s14, %s13_s14   ;;  %s961_s13 = sphi %s993_s13, %s1136_s13   ;;  %s957_s12 = sphi %s991_s12, %s1135_s12  }
   0x3   : > { %p27_p1 = scmp.ge.s32.totalorder %s25_s15, 2  ;;  %p155_p2 = scmp.lt.s32.totalorder %s965_s14, 3 }
   0x5   : > { %s1138_s15 = smov (%p27_p1, %s25_s15), 0  ;;  %p156_p3 = pnand %p844_p0, %p155_p2 }
   0x6   : > { %s968_s26 = smov (!%p156_p3), 64   ;;  %s969_s27 = smov (!%p156_p3), 32  }
   0x7   : > { %159 = sbr.rel (%p156_p3) target bundleno = 4631 (0x1217), region = 32  ;;  %p183_p4 = scmp.lt.s32.totalorder (!%p156_p3), %s957_s12, 1 }
   0x8   : > { %s970_s5 = smov (!%p156_p3), 96  }
   0xc   : > { %v206_v0 = vld [vmem:[%s1132_s1 + $0x18] sm:$0xff]  ;;  %v205_v1 = vld [vmem:[%s1132_s1 + $0x10] sm:$0xff]  ;;  %vm201_vm0 = vcmask 253952   ;;  %v967_v2 = vmov 0.0   ;;  %v204_v3 = vld [vmem:[%s1132_s1 + $0x8] sm:$0xff]  ;;  %vm209_vm1 = vcmask 261120  }
   0xd   : > { %225 = vmatpush.msra.mxu0 %v206_v0  ;;  %202 = vst.msk [vmem:[#allocation2] sm:$0x1] %vm201_vm0, %v967_v2  ;;  %303 = vmatpush.msra.mxu1 %v206_v0  ;;  %v893_v4 = vld [vmem:[%s1133_s2] ss:$0 sm:$0xff]  ;;  %s1140_s12 = smov (!%p183_p4, %s957_s12), 1 }
   0xe   : > { %371 = vmatpush.msra.mxu2 %v206_v0  ;;  %439 = vmatpush.msra.mxu3 %v206_v0  ;;  %v203_v5 = vld [vmem:[%s1132_s1] sm:$0xff]  ;;  %s845_s28 = sshll.u32 %s1140_s12, 3 }
   0xf   : > { %226 = vmatpush.msra.mxu0 %v205_v1  ;;  %304 = vmatpush.msra.mxu1 %v205_v1  ;;  %s1043_s4 = scalar_lea.vmem %s1131_s0, %s845_s28  ;;  %s1054_s8 = scalar_lea.vmem %s1134_s3, %s845_s28 }
  0x10   : > { %256 = vrot.lane.b32.xlu0 %v893_v4, %s968_s26  ;;  %372 = vmatpush.msra.mxu2 %v205_v1  ;;  %v233_v11 = vld [vmem:[%s1043_s4] sm:$0x1]  ;;  %v311_v40 = vld [vmem:[%s1043_s4 + $0x1] sm:$0x1]  ;;  %v379_v4 = vld [vmem:[%s1043_s4 + $0x2] sm:$0x1] }
  0x11   : > { %227 = vmatpush.msra.mxu0 %v204_v3  ;;  %305 = vmatpush.msra.mxu1 %v204_v3 }
  0x12   : > { %373 = vmatpush.msra.mxu2 %v204_v3  ;;  %440 = vmatpush.msra.mxu3 %v205_v1 }
  0x13   : > { %228 = vmatpush.msra.mxu0 %v203_v5  ;;  %306 = vmatpush.msra.mxu1 %v203_v5 }
  0x14   : > { %v208_v6 = vld [vmem:[#allocation2] sm:$0x1]  ;;  %374 = vmatpush.msra.mxu2 %v203_v5  ;;  %441 = vmatpush.msra.mxu3 %v204_v3 }
  0x15   : > { %v894_v7 = vld [vmem:[#allocation2] ss:$0 sm:$0xff]  ;;  %847 = vmatmul.msk.f32.vlgmr.msra.gmra.mxu0 %vm209_vm1, %v208_v6  ;;  %575 = vmatpush.msrb.mxu1 %v206_v0 }
  0x16   : > { %278 = vrot.lane.b32.xlu2 %v894_v7, %s969_s27  ;;  %442 = vmatpush.msra.mxu3 %v203_v5 }
  0x17   : > { %507 = vmatpush.msrb.mxu0 %v206_v0  ;;  %576 = vmatpush.msrb.mxu1 %v205_v1 }
  0x18   : > { %643 = vmatpush.msrb.mxu2 %v206_v0  ;;  %711 = vmatpush.msrb.mxu3 %v206_v0 }
  0x19   : > { %508 = vmatpush.msrb.mxu0 %v205_v1  ;;  %577 = vmatpush.msrb.mxu1 %v204_v3 }
  0x1a   : > { %644 = vmatpush.msrb.mxu2 %v205_v1  ;;  %712 = vmatpush.msrb.mxu3 %v205_v1 }
  0x1b   : > { %509 = vmatpush.msrb.mxu0 %v204_v3  ;;  %578 = vmatpush.msrb.mxu1 %v203_v5 }
  0x1c   : > { %645 = vmatpush.msrb.mxu2 %v204_v3  ;;  %713 = vmatpush.msrb.mxu3 %v204_v3 }
  0x1d   : > { %510 = vmatpush.msrb.mxu0 %v203_v5 }
  0x1e   : > { %646 = vmatpush.msrb.mxu2 %v203_v5  ;;  %714 = vmatpush.msrb.mxu3 %v203_v5 }
  0x70   : > { %v279_v31 = vpop.permute.xlu2 %278 }
  0x82   : > { %v1029_v8 = vpop.permute.xlu0 %256 }
  0x92   : > { %v230_v9 = vpop.f32.mrf.mxu0 }
  0x93   : > { %v259_v10 = vadd.f32 %v1029_v8, %v230_v9  ;;  %v234_v12 = vadd.f32 %v233_v11, %v230_v9 }
  0x95   : > { %261 = vrot.lane.b32.xlu0 %v259_v10, %s968_s26  ;;  %v848_v13 = vmul.f32 -1.442695, %v234_v12 }
  0x97   : > { %895 = vpow2.f32 %v848_v13 }
  0x9d   : > { %v896_v14 = vpop.eup %895 }
  0x9e   : > { %v238_v15 = vadd.f32 1.0, %v896_v14 }
  0xa0   : > { %897 = vrcp.f32 %v238_v15  ;;  %v250_v21 = vand.u32 2147483648, %v238_v15  ;;  %vm244_vm3 = vweird.f32 %v238_v15  ;;  %v248_v22 = vand.u32 2147483647, %v238_v15 }
  0xa2   : > { %v251_v24 = vor.u32 1.1754944e-38, %v250_v21  ;;  %vm249_vm5 = vcmp.eq.f32.partialorder %v248_v22, 8.507059e+37 }
  0xa6   : > { %v898_v16 = vpop.eup %897 }
  0xa7   : > { %v240_v17 = vmul.f32 %v898_v16, %v238_v15  ;;  %vm245_vm2 = vweird.f32 %v898_v16 }
  0xa8   : > { %vm246_vm4 = vmor %vm244_vm3, %vm245_vm2 }
  0xa9   : > { %v241_v18 = vsub.f32 1.0, %v240_v17 }
  0xab   : > { %v242_v19 = vmul.f32 %v898_v16, %v241_v18 }
  0xad   : > { %v243_v20 = vadd.f32 %v898_v16, %v242_v19 }
  0xaf   : > { %v247_v23 = vsel %vm246_vm4, %v898_v16, %v243_v20 }
  0xb0   : > { %v252_v25 = vsel %vm249_vm5, %v251_v24, %v247_v23 }
  0xb1   : > { %v271_v32 = vsub.f32 1.0, %v252_v25  ;;  %v281_v34 = vmul.f32 %v279_v31, %v252_v25 }
 0x107   : > { %v262_v26 = vpop.permute.xlu0 %261 }
 0x108   : > { %v264_v27 = vmul.f32 %v262_v26, %v252_v25 }
 0x10a   : > { %266 = vrot.lane.b32.xlu1 %v264_v27, %s968_s26 }
 0x17c   : > { %v267_v28 = vpop.permute.xlu1 %266 }
 0x17d   : > { %v269_v29 = vadd.f32 %v267_v28, %v233_v11 }
 0x17f   : > { %899 = vtanh.f32 %v269_v29 }
 0x185   : > { %v900_v30 = vpop.eup %899 }
 0x186   : > { %273 = vrot.lane.b32.xlu1 %v900_v30, %s970_s5 }
 0x1f8   : > { %v274_v33 = vpop.permute.xlu1 %273 }
 0x1f9   : > { %v276_v35 = vmul.f32 %v274_v33, %v271_v32  ;;  %v447_v33 = vld [vmem:[%s1043_s4 + $0x3] sm:$0x1] }
 0x1fb   : > { %v282_v36 = vadd.f32 %v281_v34, %v276_v35 }
 0x1fd   : > { %284 = vrot.lane.b32.xlu2 %v282_v36, %s970_s5 }
 0x257   : > { %v285_v37 = vpop.permute.xlu2 %284 }
 0x258   : > { %288 = vst.msk [vmem:[%s1054_s8] sm:$0x1] %vm201_vm0, %v285_v37  ;;  %849 = vmatmul.msk.f32.vlgmr.msra.gmra.mxu1 %vm209_vm1, %v285_v37 }
 0x2d5   : > { %v308_v38 = vpop.f32.mrf.mxu1 }
 0x2d6   : > { %v332_v39 = vadd.f32 %v308_v38, %v1029_v8  ;;  %v312_v41 = vadd.f32 %v311_v40, %v308_v38 }
 0x2d8   : > { %334 = vrot.lane.b32.xlu0 %v332_v39, %s968_s26  ;;  %v850_v42 = vmul.f32 -1.442695, %v312_v41 }
 0x2da   : > { %901 = vpow2.f32 %v850_v42 }
 0x2e0   : > { %v902_v43 = vpop.eup %901 }
 0x2e1   : > { %v316_v44 = vadd.f32 1.0, %v902_v43 }
 0x2e3   : > { %903 = vrcp.f32 %v316_v44  ;;  %v328_v50 = vand.u32 2147483648, %v316_v44  ;;  %vm322_vm7 = vweird.f32 %v316_v44  ;;  %v326_v51 = vand.u32 2147483647, %v316_v44 }
 0x2e5   : > { %v329_v53 = vor.u32 1.1754944e-38, %v328_v50  ;;  %vm327_vm9 = vcmp.eq.f32.partialorder %v326_v51, 8.507059e+37 }
 0x2e9   : > { %v904_v45 = vpop.eup %903 }
 0x2ea   : > { %v318_v46 = vmul.f32 %v904_v45, %v316_v44  ;;  %vm323_vm6 = vweird.f32 %v904_v45 }
 0x2eb   : > { %vm324_vm8 = vmor %vm322_vm7, %vm323_vm6 }
 0x2ec   : > { %v319_v47 = vsub.f32 1.0, %v318_v46 }
 0x2ee   : > { %v320_v48 = vmul.f32 %v904_v45, %v319_v47 }
 0x2f0   : > { %v321_v49 = vadd.f32 %v904_v45, %v320_v48 }
 0x2f2   : > { %v325_v52 = vsel %vm324_vm8, %v904_v45, %v321_v49 }
 0x2f3   : > { %v330_v55 = vsel %vm327_vm9, %v329_v53, %v325_v52 }
 0x2f4   : > { %v344_v60 = vsub.f32 1.0, %v330_v55  ;;  %v350_v62 = vmul.f32 %v330_v55, %v282_v36 }
 0x34a   : > { %v335_v54 = vpop.permute.xlu0 %334 }
 0x34b   : > { %v337_v56 = vmul.f32 %v335_v54, %v330_v55 }
 0x34d   : > { %339 = vrot.lane.b32.xlu1 %v337_v56, %s968_s26 }
 0x3bf   : > { %v340_v57 = vpop.permute.xlu1 %339 }
 0x3c0   : > { %v342_v58 = vadd.f32 %v340_v57, %v311_v40 }
 0x3c2   : > { %905 = vtanh.f32 %v342_v58 }
 0x3c8   : > { %v906_v59 = vpop.eup %905 }
 0x3c9   : > { %346 = vrot.lane.b32.xlu2 %v906_v59, %s970_s5 }
 0x423   : > { %v347_v61 = vpop.permute.xlu2 %346 }
 0x424   : > { %v349_v63 = vmul.f32 %v347_v61, %v344_v60  ;;  %v515_v61 = vld [vmem:[%s1043_s4 + $0x4] sm:$0x1] }
 0x426   : > { %v351_v0 = vadd.f32 %v350_v62, %v349_v63 }
 0x428   : > { %353 = vrot.lane.b32.xlu0 %v351_v0, %s970_s5 }
 0x49a   : > { %v354_v1 = vpop.permute.xlu0 %353 }
 0x49b   : > { %356 = vst.msk [vmem:[%s1054_s8 + $0x1] sm:$0x1] %vm201_vm0, %v354_v1  ;;  %851 = vmatmul.msk.f32.vlgmr.msra.gmra.mxu2 %vm209_vm1, %v354_v1 }
 0x51e   : > { %v376_v2 = vpop.f32.mrf.mxu2 }
 0x51f   : > { %v400_v3 = vadd.f32 %v376_v2, %v1029_v8  ;;  %v380_v5 = vadd.f32 %v379_v4, %v376_v2 }
 0x521   : > { %402 = vrot.lane.b32.xlu1 %v400_v3, %s968_s26  ;;  %v852_v6 = vmul.f32 -1.442695, %v380_v5 }
 0x523   : > { %907 = vpow2.f32 %v852_v6 }
 0x529   : > { %v908_v7 = vpop.eup %907 }
 0x52a   : > { %v384_v9 = vadd.f32 1.0, %v908_v7 }
 0x52c   : > { %909 = vrcp.f32 %v384_v9  ;;  %v396_v15 = vand.u32 2147483648, %v384_v9  ;;  %vm390_vm11 = vweird.f32 %v384_v9  ;;  %v394_v16 = vand.u32 2147483647, %v384_v9 }
 0x52e   : > { %v397_v18 = vor.u32 1.1754944e-38, %v396_v15  ;;  %vm395_vm13 = vcmp.eq.f32.partialorder %v394_v16, 8.507059e+37 }
 0x532   : > { %v910_v10 = vpop.eup %909 }
 0x533   : > { %v386_v11 = vmul.f32 %v910_v10, %v384_v9  ;;  %vm391_vm10 = vweird.f32 %v910_v10 }
 0x534   : > { %vm392_vm12 = vmor %vm390_vm11, %vm391_vm10 }
 0x535   : > { %v387_v12 = vsub.f32 1.0, %v386_v11 }
 0x537   : > { %v388_v13 = vmul.f32 %v910_v10, %v387_v12 }
 0x539   : > { %v389_v14 = vadd.f32 %v910_v10, %v388_v13 }
 0x53b   : > { %v393_v17 = vsel %vm392_vm12, %v910_v10, %v389_v14 }
 0x53c   : > { %v398_v20 = vsel %vm395_vm13, %v397_v18, %v393_v17 }
 0x53d   : > { %v412_v25 = vsub.f32 1.0, %v398_v20  ;;  %v418_v27 = vmul.f32 %v398_v20, %v351_v0 }
 0x593   : > { %v403_v19 = vpop.permute.xlu1 %402 }
 0x594   : > { %v405_v21 = vmul.f32 %v403_v19, %v398_v20 }
 0x596   : > { %407 = vrot.lane.b32.xlu2 %v405_v21, %s968_s26 }
 0x5f0   : > { %v408_v22 = vpop.permute.xlu2 %407 }
 0x5f1   : > { %v410_v23 = vadd.f32 %v408_v22, %v379_v4 }
 0x5f3   : > { %911 = vtanh.f32 %v410_v23 }
 0x5f9   : > { %v912_v24 = vpop.eup %911 }
 0x5fa   : > { %414 = vrot.lane.b32.xlu0 %v912_v24, %s970_s5 }
 0x66c   : > { %v415_v26 = vpop.permute.xlu0 %414 }
 0x66d   : > { %v417_v28 = vmul.f32 %v415_v26, %v412_v25  ;;  %v583_v26 = vld [vmem:[%s1043_s4 + $0x5] sm:$0x1] }
 0x66f   : > { %v419_v29 = vadd.f32 %v418_v27, %v417_v28 }
 0x671   : > { %421 = vrot.lane.b32.xlu1 %v419_v29, %s970_s5 }
 0x6e3   : > { %v422_v30 = vpop.permute.xlu1 %421 }
 0x6e4   : > { %424 = vst.msk [vmem:[%s1054_s8 + $0x2] sm:$0x1] %vm201_vm0, %v422_v30  ;;  %853 = vmatmul.msk.f32.vlgmr.msra.gmra.mxu3 %vm209_vm1, %v422_v30 }
 0x767   : > { %v444_v31 = vpop.f32.mrf.mxu3 }
 0x768   : > { %v468_v32 = vadd.f32 %v444_v31, %v1029_v8  ;;  %v448_v34 = vadd.f32 %v447_v33, %v444_v31 }
 0x76a   : > { %470 = vrot.lane.b32.xlu2 %v468_v32, %s968_s26  ;;  %v854_v35 = vmul.f32 -1.442695, %v448_v34 }
 0x76c   : > { %913 = vpow2.f32 %v854_v35 }
 0x772   : > { %v914_v36 = vpop.eup %913 }
 0x773   : > { %v452_v37 = vadd.f32 1.0, %v914_v36 }
 0x775   : > { %915 = vrcp.f32 %v452_v37  ;;  %v464_v43 = vand.u32 2147483648, %v452_v37  ;;  %vm458_vm15 = vweird.f32 %v452_v37  ;;  %v462_v44 = vand.u32 2147483647, %v452_v37 }
 0x777   : > { %v465_v46 = vor.u32 1.1754944e-38, %v464_v43  ;;  %vm463_vm3 = vcmp.eq.f32.partialorder %v462_v44, 8.507059e+37 }
 0x77b   : > { %v916_v38 = vpop.eup %915 }
 0x77c   : > { %v454_v39 = vmul.f32 %v916_v38, %v452_v37  ;;  %vm459_vm14 = vweird.f32 %v916_v38 }
 0x77d   : > { %vm460_vm2 = vmor %vm458_vm15, %vm459_vm14 }
 0x77e   : > { %v455_v40 = vsub.f32 1.0, %v454_v39 }
 0x780   : > { %v456_v41 = vmul.f32 %v916_v38, %v455_v40 }
 0x782   : > { %v457_v42 = vadd.f32 %v916_v38, %v456_v41 }
 0x784   : > { %v461_v45 = vsel %vm460_vm2, %v916_v38, %v457_v42 }
 0x785   : > { %v466_v48 = vsel %vm463_vm3, %v465_v46, %v461_v45 }
 0x786   : > { %v480_v53 = vsub.f32 1.0, %v466_v48  ;;  %v486_v55 = vmul.f32 %v466_v48, %v419_v29 }
 0x7c4   : > { %v471_v47 = vpop.permute.xlu2 %470 }
 0x7c5   : > { %v473_v49 = vmul.f32 %v471_v47, %v466_v48 }
 0x7c7   : > { %475 = vrot.lane.b32.xlu0 %v473_v49, %s968_s26 }
 0x839   : > { %v476_v50 = vpop.permute.xlu0 %475 }
 0x83a   : > { %v478_v51 = vadd.f32 %v476_v50, %v447_v33 }
 0x83c   : > { %917 = vtanh.f32 %v478_v51 }
 0x842   : > { %v918_v52 = vpop.eup %917 }
 0x843   : > { %482 = vrot.lane.b32.xlu1 %v918_v52, %s970_s5 }
 0x8b5   : > { %v483_v54 = vpop.permute.xlu1 %482 }
 0x8b6   : > { %v485_v56 = vmul.f32 %v483_v54, %v480_v53  ;;  %v651_v54 = vld [vmem:[%s1043_s4 + $0x6] sm:$0x1] }
 0x8b8   : > { %v487_v57 = vadd.f32 %v486_v55, %v485_v56 }
 0x8ba   : > { %489 = vrot.lane.b32.xlu2 %v487_v57, %s970_s5 }
 0x914   : > { %v490_v58 = vpop.permute.xlu2 %489 }
 0x915   : > { %492 = vst.msk [vmem:[%s1054_s8 + $0x3] sm:$0x1] %vm201_vm0, %v490_v58  ;;  %855 = vmatmul.msk.f32.vlgmr.msrb.gmra.mxu0 %vm209_vm1, %v490_v58 }
 0x992   : > { %v512_v59 = vpop.f32.mrf.mxu0 }
 0x993   : > { %v536_v60 = vadd.f32 %v512_v59, %v1029_v8  ;;  %v516_v62 = vadd.f32 %v515_v61, %v512_v59 }
 0x995   : > { %538 = vrot.lane.b32.xlu0 %v536_v60, %s968_s26  ;;  %v856_v63 = vmul.f32 -1.442695, %v516_v62 }
 0x997   : > { %919 = vpow2.f32 %v856_v63 }
 0x99d   : > { %v920_v0 = vpop.eup %919 }
 0x99e   : > { %v520_v1 = vadd.f32 1.0, %v920_v0 }
 0x9a0   : > { %921 = vrcp.f32 %v520_v1  ;;  %v532_v7 = vand.u32 2147483648, %v520_v1  ;;  %vm526_vm5 = vweird.f32 %v520_v1  ;;  %v530_v9 = vand.u32 2147483647, %v520_v1 }
 0x9a2   : > { %v533_v11 = vor.u32 1.1754944e-38, %v532_v7  ;;  %vm531_vm7 = vcmp.eq.f32.partialorder %v530_v9, 8.507059e+37 }
 0x9a6   : > { %v922_v2 = vpop.eup %921 }
 0x9a7   : > { %v522_v3 = vmul.f32 %v922_v2, %v520_v1  ;;  %vm527_vm4 = vweird.f32 %v922_v2 }
 0x9a8   : > { %vm528_vm6 = vmor %vm526_vm5, %vm527_vm4 }
 0x9a9   : > { %v523_v4 = vsub.f32 1.0, %v522_v3 }
 0x9ab   : > { %v524_v5 = vmul.f32 %v922_v2, %v523_v4 }
 0x9ad   : > { %v525_v6 = vadd.f32 %v922_v2, %v524_v5 }
 0x9af   : > { %v529_v10 = vsel %vm528_vm6, %v922_v2, %v525_v6 }
 0x9b0   : > { %v534_v13 = vsel %vm531_vm7, %v533_v11, %v529_v10 }
 0x9b1   : > { %v548_v18 = vsub.f32 1.0, %v534_v13  ;;  %v554_v20 = vmul.f32 %v534_v13, %v487_v57 }
 0xa07   : > { %v539_v12 = vpop.permute.xlu0 %538 }
 0xa08   : > { %v541_v14 = vmul.f32 %v539_v12, %v534_v13 }
 0xa0a   : > { %543 = vrot.lane.b32.xlu1 %v541_v14, %s968_s26 }
 0xa7c   : > { %v544_v15 = vpop.permute.xlu1 %543 }
 0xa7d   : > { %v546_v16 = vadd.f32 %v544_v15, %v515_v61 }
 0xa7f   : > { %923 = vtanh.f32 %v546_v16 }
 0xa85   : > { %v924_v17 = vpop.eup %923 }
 0xa86   : > { %550 = vrot.lane.b32.xlu2 %v924_v17, %s970_s5 }
 0xae0   : > { %v551_v19 = vpop.permute.xlu2 %550 }
 0xae1   : > { %v553_v21 = vmul.f32 %v551_v19, %v548_v18  ;;  %v719_v19 = vld [vmem:[%s1043_s4 + $0x7] sm:$0x1] }
 0xae3   : > { %v555_v22 = vadd.f32 %v554_v20, %v553_v21 }
 0xae5   : > { %557 = vrot.lane.b32.xlu0 %v555_v22, %s970_s5 }
 0xb57   : > { %v558_v23 = vpop.permute.xlu0 %557 }
 0xb58   : > { %560 = vst.msk [vmem:[%s1054_s8 + $0x4] sm:$0x1] %vm201_vm0, %v558_v23  ;;  %857 = vmatmul.msk.f32.vlgmr.msrb.gmra.mxu1 %vm209_vm1, %v558_v23 }
 0xbd5   : > { %v580_v24 = vpop.f32.mrf.mxu1 }
 0xbd6   : > { %v604_v25 = vadd.f32 %v580_v24, %v1029_v8  ;;  %v584_v27 = vadd.f32 %v583_v26, %v580_v24 }
 0xbd8   : > { %606 = vrot.lane.b32.xlu1 %v604_v25, %s968_s26  ;;  %v858_v28 = vmul.f32 -1.442695, %v584_v27 }
 0xbda   : > { %925 = vpow2.f32 %v858_v28 }
 0xbe0   : > { %v926_v29 = vpop.eup %925 }
 0xbe1   : > { %v588_v30 = vadd.f32 1.0, %v926_v29 }
 0xbe3   : > { %927 = vrcp.f32 %v588_v30  ;;  %v600_v36 = vand.u32 2147483648, %v588_v30  ;;  %vm594_vm9 = vweird.f32 %v588_v30  ;;  %v598_v37 = vand.u32 2147483647, %v588_v30 }
 0xbe5   : > { %v601_v39 = vor.u32 1.1754944e-38, %v600_v36  ;;  %vm599_vm11 = vcmp.eq.f32.partialorder %v598_v37, 8.507059e+37 }
 0xbe9   : > { %v928_v31 = vpop.eup %927 }
 0xbea   : > { %v590_v32 = vmul.f32 %v928_v31, %v588_v30  ;;  %vm595_vm8 = vweird.f32 %v928_v31 }
 0xbeb   : > { %vm596_vm10 = vmor %vm594_vm9, %vm595_vm8 }
 0xbec   : > { %v591_v33 = vsub.f32 1.0, %v590_v32 }
 0xbee   : > { %v592_v34 = vmul.f32 %v928_v31, %v591_v33 }
 0xbf0   : > { %v593_v35 = vadd.f32 %v928_v31, %v592_v34 }
 0xbf2   : > { %v597_v38 = vsel %vm596_vm10, %v928_v31, %v593_v35 }
 0xbf3   : > { %v602_v41 = vsel %vm599_vm11, %v601_v39, %v597_v38 }
 0xbf4   : > { %v616_v46 = vsub.f32 1.0, %v602_v41  ;;  %v622_v48 = vmul.f32 %v602_v41, %v555_v22 }
 0xc4a   : > { %v607_v40 = vpop.permute.xlu1 %606 }
 0xc4b   : > { %v609_v42 = vmul.f32 %v607_v40, %v602_v41 }
 0xc4d   : > { %611 = vrot.lane.b32.xlu2 %v609_v42, %s968_s26 }
 0xca7   : > { %v612_v43 = vpop.permute.xlu2 %611 }
 0xca8   : > { %v614_v44 = vadd.f32 %v612_v43, %v583_v26 }
 0xcaa   : > { %929 = vtanh.f32 %v614_v44 }
 0xcb0   : > { %v930_v45 = vpop.eup %929 }
 0xcb1   : > { %618 = vrot.lane.b32.xlu0 %v930_v45, %s970_s5 }
 0xd23   : > { %v619_v47 = vpop.permute.xlu0 %618 }
 0xd24   : > { %v621_v49 = vmul.f32 %v619_v47, %v616_v46 }
 0xd26   : > { %v623_v50 = vadd.f32 %v622_v48, %v621_v49 }
 0xd28   : > { %625 = vrot.lane.b32.xlu1 %v623_v50, %s970_s5 }
 0xd9a   : > { %v626_v51 = vpop.permute.xlu1 %625 }
 0xd9b   : > { %628 = vst.msk [vmem:[%s1054_s8 + $0x5] sm:$0x1] %vm201_vm0, %v626_v51  ;;  %859 = vmatmul.msk.f32.vlgmr.msrb.gmra.mxu2 %vm209_vm1, %v626_v51 }
 0xe1e   : > { %v648_v52 = vpop.f32.mrf.mxu2 }
 0xe1f   : > { %v672_v53 = vadd.f32 %v648_v52, %v1029_v8  ;;  %v652_v55 = vadd.f32 %v651_v54, %v648_v52 }
 0xe21   : > { %674 = vrot.lane.b32.xlu2 %v672_v53, %s968_s26  ;;  %v860_v56 = vmul.f32 -1.442695, %v652_v55 }
 0xe23   : > { %931 = vpow2.f32 %v860_v56 }
 0xe29   : > { %v932_v57 = vpop.eup %931 }
 0xe2a   : > { %v656_v58 = vadd.f32 1.0, %v932_v57 }
 0xe2c   : > { %933 = vrcp.f32 %v656_v58  ;;  %v668_v0 = vand.u32 2147483648, %v656_v58  ;;  %vm662_vm13 = vweird.f32 %v656_v58  ;;  %v666_v1 = vand.u32 2147483647, %v656_v58 }
 0xe2e   : > { %v669_v3 = vor.u32 1.1754944e-38, %v668_v0  ;;  %vm667_vm15 = vcmp.eq.f32.partialorder %v666_v1, 8.507059e+37 }
 0xe32   : > { %v934_v59 = vpop.eup %933 }
 0xe33   : > { %v658_v60 = vmul.f32 %v934_v59, %v656_v58  ;;  %vm663_vm12 = vweird.f32 %v934_v59 }
 0xe34   : > { %vm664_vm14 = vmor %vm662_vm13, %vm663_vm12 }
 0xe35   : > { %v659_v61 = vsub.f32 1.0, %v658_v60 }
 0xe37   : > { %v660_v62 = vmul.f32 %v934_v59, %v659_v61 }
 0xe39   : > { %v661_v63 = vadd.f32 %v934_v59, %v660_v62 }
 0xe3b   : > { %v665_v2 = vsel %vm664_vm14, %v934_v59, %v661_v63 }
 0xe3c   : > { %v670_v5 = vsel %vm667_vm15, %v669_v3, %v665_v2 }
 0xe3d   : > { %v684_v11 = vsub.f32 1.0, %v670_v5  ;;  %v690_v13 = vmul.f32 %v670_v5, %v623_v50 }
 0xe7b   : > { %v675_v4 = vpop.permute.xlu2 %674 }
 0xe7c   : > { %v677_v6 = vmul.f32 %v675_v4, %v670_v5 }
 0xe7e   : > { %679 = vrot.lane.b32.xlu0 %v677_v6, %s968_s26 }
 0xef0   : > { %v680_v7 = vpop.permute.xlu0 %679 }
 0xef1   : > { %v682_v9 = vadd.f32 %v680_v7, %v651_v54 }
 0xef3   : > { %935 = vtanh.f32 %v682_v9 }
 0xef9   : > { %v936_v10 = vpop.eup %935 }
 0xefa   : > { %686 = vrot.lane.b32.xlu1 %v936_v10, %s970_s5 }
 0xf6c   : > { %v687_v12 = vpop.permute.xlu1 %686 }
 0xf6d   : > { %v689_v14 = vmul.f32 %v687_v12, %v684_v11 }
 0xf6f   : > { %v691_v15 = vadd.f32 %v690_v13, %v689_v14 }
 0xf71   : > { %693 = vrot.lane.b32.xlu2 %v691_v15, %s970_s5 }
 0xfcb   : > { %v694_v16 = vpop.permute.xlu2 %693 }
 0xfcc   : > { %696 = vst.msk [vmem:[%s1054_s8 + $0x6] sm:$0x1] %vm201_vm0, %v694_v16  ;;  %861 = vmatmul.msk.f32.vlgmr.msrb.gmra.mxu3 %vm209_vm1, %v694_v16 }
0x104f   : > { %v716_v17 = vpop.f32.mrf.mxu3 }
0x1050   : > { %v740_v18 = vadd.f32 %v716_v17, %v1029_v8  ;;  %v720_v20 = vadd.f32 %v719_v19, %v716_v17 }
0x1052   : > { %742 = vrot.lane.b32.xlu0 %v740_v18, %s968_s26  ;;  %v862_v21 = vmul.f32 -1.442695, %v720_v20 }
0x1054   : > { %937 = vpow2.f32 %v862_v21 }
0x105a   : > { %v938_v22 = vpop.eup %937 }
0x105b   : > { %v724_v23 = vadd.f32 1.0, %v938_v22 }
0x105d   : > { %939 = vrcp.f32 %v724_v23  ;;  %v736_v29 = vand.u32 2147483648, %v724_v23  ;;  %vm730_vm1 = vweird.f32 %v724_v23  ;;  %v734_v30 = vand.u32 2147483647, %v724_v23 }
0x105f   : > { %v737_v31 = vor.u32 1.1754944e-38, %v736_v29  ;;  %vm735_vm4 = vcmp.eq.f32.partialorder %v734_v30, 8.507059e+37 }
0x1063   : > { %v940_v24 = vpop.eup %939 }
0x1064   : > { %v726_v25 = vmul.f32 %v940_v24, %v724_v23  ;;  %vm731_vm2 = vweird.f32 %v940_v24 }
0x1065   : > { %vm732_vm3 = vmor %vm730_vm1, %vm731_vm2 }
0x1066   : > { %v727_v26 = vsub.f32 1.0, %v726_v25 }
0x1068   : > { %v728_v27 = vmul.f32 %v940_v24, %v727_v26 }
0x106a   : > { %v729_v28 = vadd.f32 %v940_v24, %v728_v27 }
0x106c   : > { %v733_v8 = vsel %vm732_vm3, %v940_v24, %v729_v28 }
0x106d   : > { %v738_v33 = vsel %vm735_vm4, %v737_v31, %v733_v8 }
0x106e   : > { %v752_v38 = vsub.f32 1.0, %v738_v33  ;;  %v758_v40 = vmul.f32 %v738_v33, %v691_v15 }
0x10c4   : > { %v743_v32 = vpop.permute.xlu0 %742 }
0x10c5   : > { %v745_v34 = vmul.f32 %v743_v32, %v738_v33 }
0x10c7   : > { %747 = vrot.lane.b32.xlu1 %v745_v34, %s968_s26 }
0x1139   : > { %v748_v35 = vpop.permute.xlu1 %747 }
0x113a   : > { %v750_v36 = vadd.f32 %v748_v35, %v719_v19 }
0x113c   : > { %941 = vtanh.f32 %v750_v36 }
0x1142   : > { %v942_v37 = vpop.eup %941 }
0x1143   : > { %754 = vrot.lane.b32.xlu2 %v942_v37, %s970_s5 }
0x119d   : > { %v755_v39 = vpop.permute.xlu2 %754 }
0x119e   : > { %v757_v41 = vmul.f32 %v755_v39, %v752_v38 }
0x11a0   : > { %v759_v42 = vadd.f32 %v758_v40, %v757_v41 }
0x11a2   : > { %761 = vrot.lane.b32.xlu0 %v759_v42, %s970_s5 }
0x1214   : > { %v762_v43 = vpop.permute.xlu0 %761 }
0x1215   : > { %764 = vst.msk [vmem:[%s1054_s8 + $0x7] sm:$0x1] %vm201_vm0, %v762_v43 }
0x1216   : > { %765 = vst.msk [vmem:[#allocation2] sm:$0x1] %vm201_vm0, %v762_v43 }
0x1217 PF: > { %s13_s14 = sadd.s32 1, %s965_s14   ;;  %s1135_s12 = smov %s961_s13 }
0x1218   : > { %p10_p5 = scmp.ge.s32.totalorder %s13_s14, 4   ;;  %s1136_s13 = smov %s1138_s15 }
0x121a   :  { %12 = sbr.rel (!%p10_p5) target bundleno = 2 (0x2), region = 66 }

// kernel: language_model_forward.3
= control target key start
LH: loop header
LB: loop body
LE: loop exit
PB: predicated region body
PF: predicated region fallthrough
CT: control target
= control target key end

     0   :  { %vm24_vm0 = vcmask 261120   ;;  %vm54_vm1 = vcmask 785408   ;;  %s115_s1 = inlined_call_operand.vmem [shape: f32[32,96], index: 1, kind: input, shape index: {}]   ;;  %s116_s2 = inlined_call_operand.vmem [shape: f32[1,96], index: 2, kind: input, shape index: {}]   ;;  %s117_s0 = inlined_call_operand.vmem [shape: f32[16,32], index: 0, kind: input, shape index: {}]   ;;  %s118_s3 = inlined_call_operand.vmem [shape: f32[16,96], index: 3, kind: output, shape index: {}]  }
   0x1   :  { %v19_v0 = vld [vmem:[%s115_s1 + $0x18] sm:$0xff]  ;;  %v18_v1 = vld [vmem:[%s115_s1 + $0x10] sm:$0xff]  ;;  %v17_v2 = vld [vmem:[%s115_s1 + $0x8] sm:$0xff] }
   0x2   :  { %43 = vmatpush.msra.mxu0 %v19_v0  ;;  %63 = vmatpush.msra.mxu1 %v19_v0  ;;  %v16_v3 = vld [vmem:[%s115_s1] sm:$0xff]  ;;  %v15_v5 = vld [vmem:[%s117_s0 + $0x8] sm:$0xff] }
   0x3   :  { %v14_v4 = vld [vmem:[%s117_s0] sm:$0xff] }
   0x4   :  { %44 = vmatpush.msra.mxu0 %v18_v1  ;;  %64 = vmatpush.msra.mxu1 %v18_v1  ;;  %v67_v6 = vld [vmem:[%s116_s2] ss:$0 sm:$0xff] }
   0x6   :  { %45 = vmatpush.msra.mxu0 %v17_v2  ;;  %65 = vmatpush.msra.mxu1 %v17_v2 }
   0x8   :  { %46 = vmatpush.msra.mxu0 %v16_v3  ;;  %66 = vmatpush.msra.mxu1 %v16_v3 }
   0x9   :  { %61 = vmatmul.msk.f32.vlgmr.msra.gmra.mxu0 %vm24_vm0, %v14_v4  ;;  %62 = vmatmul.msk.f32.vlgmr.msra.gmra.mxu1 %vm24_vm0, %v15_v5 }
  0x86   :  { %v48_v7 = vpop.f32.mrf.mxu0  ;;  %v51_v8 = vpop.f32.mrf.mxu1 }
  0x87   :  { %v49_v9 = vadd.f32 %v67_v6, %v48_v7  ;;  %v52_v10 = vadd.f32 %v67_v6, %v51_v8 }
  0x89   :  { %55 = vst.msk [vmem:[%s118_s3] sm:$0xff] %vm54_vm1, %v49_v9 }
  0x8a   :  { %56 = vst.msk [vmem:[%s118_s3 + $0x8] sm:$0xff] %vm54_vm1, %v52_v10 }

// kernel: language_model_forward.5
= control target key start
LH: loop header
LB: loop body
LE: loop exit
PB: predicated region body
PF: predicated region fallthrough
CT: control target
= control target key end

     0   :  { %s158_s0 = inlined_call_operand.vmem [shape: f32[16,32], index: 0, kind: input, shape index: {}]   ;;  %s159_s1 = inlined_call_operand.vmem [shape: f32[32,128], index: 1, kind: input, shape index: {}]   ;;  %s160_s2 = inlined_call_operand.vmem [shape: f32[1,128], index: 2, kind: input, shape index: {}]   ;;  %s161_s3 = inlined_call_operand.hbm [shape: f32[16,128], index: 3, kind: output, shape index: {}]  }
   0x1   :  { %v20_v0 = vld [vmem:[%s159_s1 + $0x18] sm:$0xff]  ;;  %v19_v1 = vld [vmem:[%s159_s1 + $0x10] sm:$0xff]  ;;  %v18_v2 = vld [vmem:[%s159_s1 + $0x8] sm:$0xff] }
   0x2   :  { %44 = vmatpush.msra.mxu0 %v20_v0  ;;  %77 = vmatpush.msra.mxu1 %v20_v0 }
   0x3   :  { %8 = vsyncpa [#allocation3], 0  ;;  %v17_v3 = vld [vmem:[%s159_s1] sm:$0xff]  ;;  %vm25_vm0 = vcmask 261120   ;;  %v16_v5 = vld [vmem:[%s158_s0 + $0x8] sm:$0xff]  ;;  %s111_s1 = smov [#allocation2]  }
   0x4   :  { %45 = vmatpush.msra.mxu0 %v19_v1  ;;  %78 = vmatpush.msra.mxu1 %v19_v1  ;;  %v15_v4 = vld [vmem:[%s158_s0] sm:$0xff]  ;;  %s61_s26 = sshll.u32 %s111_s1, 4  ;;  %s63_s29 = sshll.u32 %s161_s3, 4  ;;  %s62_s26 = int_to_ptr.vmem [resolvable:$true] %s61_s26  ;;  %s64_s29 = int_to_ptr.hbm [resolvable:$true] %s63_s29 }
   0x5   :  { %v84_v6 = vld [vmem:[%s160_s2] ss:$0 sm:$0xff]  ;;  %s112_s0 = smov 128   ;;  %s113_s30 = smov 8  }
   0x6   :  { %46 = vmatpush.msra.mxu0 %v18_v2  ;;  %79 = vmatpush.msra.mxu1 %v18_v2 }
   0x8   :  { %47 = vmatpush.msra.mxu0 %v17_v3  ;;  %80 = vmatpush.msra.mxu1 %v17_v3 }
   0x9   :  { %75 = vmatmul.msk.f32.vlgmr.msra.gmra.mxu0 %vm25_vm0, %v15_v4  ;;  %76 = vmatmul.msk.f32.vlgmr.msra.gmra.mxu1 %vm25_vm0, %v16_v5 }
  0x86   :  { %v49_v7 = vpop.f32.mrf.mxu0  ;;  %v52_v8 = vpop.f32.mrf.mxu1 }
  0x87   :  { %v50_v9 = vadd.f32 %v84_v6, %v49_v7  ;;  %v53_v10 = vadd.f32 %v84_v6, %v52_v8 }
  0x89   :  { %55 = vst [vmem:[#allocation2] sm:$0xff] %v50_v9 }
  0x8a   :  { %56 = vst [vmem:[#allocation2 + $0x8] sm:$0xff] %v53_v10 }
  0x8b   :  { %69 = dma.vmem_to_hbm [thread:$0]  %s62_s26, 256, %s64_s29, [#allocation3], %s112_s0, %s112_s0, %s113_s30  }
  0x8c   :  { %109 = dma.done.wait [#allocation3], 256  }
  0x8d   :  { %110 = vsyncadd [#allocation3], 4294967040 }
  0x8e   :  { %74 = vsyncpa [#allocation3], 1 }

// kernel: language_model_forward.4
= control target key start
LH: loop header
LB: loop body
LE: loop exit
PB: predicated region body
PF: predicated region fallthrough
CT: control target
= control target key end

     0   :  { %s991_s12 = smov 0   ;;  %s993_s13 = smov 0   ;;  %s1131_s0 = inlined_call_operand.vmem [shape: f32[2,8,96], index: 0, kind: input, shape index: {}]   ;;  %s1132_s1 = inlined_call_operand.vmem [shape: f32[32,96], index: 1, kind: input, shape index: {}]   ;;  %s1133_s2 = inlined_call_operand.vmem [shape: f32[1,32], index: 2, kind: input, shape index: {}]   ;;  %s1134_s3 = inlined_call_operand.vmem [shape: f32[2,8,32], index: 3, kind: output, shape index: {}]  }
   0x1   :  { %s995_s14 = smov 0  }
   0x2 LB: > { %s25_s15 = sadd.s32 1, %s961_s13  ;;  %p844_p0 = scmp.ge.s32.totalorder %s965_s14, 1  ;;  %s965_s14 = sphi %s995_s14, %s13_s14   ;;  %s961_s13 = sphi %s993_s13, %s1136_s13   ;;  %s957_s12 = sphi %s991_s12, %s1135_s12  }
   0x3   : > { %p27_p1 = scmp.ge.s32.totalorder %s25_s15, 2  ;;  %p155_p2 = scmp.lt.s32.totalorder %s965_s14, 3 }
   0x5   : > { %s1138_s15 = smov (%p27_p1, %s25_s15), 0  ;;  %p156_p3 = pnand %p844_p0, %p155_p2 }
   0x6   : > { %s968_s26 = smov (!%p156_p3), 64   ;;  %s969_s27 = smov (!%p156_p3), 32  }
   0x7   : > { %159 = sbr.rel (%p156_p3) target bundleno = 4631 (0x1217), region = 32  ;;  %p183_p4 = scmp.lt.s32.totalorder (!%p156_p3), %s957_s12, 1 }
   0x8   : > { %s970_s5 = smov (!%p156_p3), 96  }
   0xc   : > { %v206_v0 = vld [vmem:[%s1132_s1 + $0x18] sm:$0xff]  ;;  %v205_v1 = vld [vmem:[%s1132_s1 + $0x10] sm:$0xff]  ;;  %vm201_vm0 = vcmask 253952   ;;  %v967_v2 = vmov 0.0   ;;  %v204_v3 = vld [vmem:[%s1132_s1 + $0x8] sm:$0xff]  ;;  %vm209_vm1 = vcmask 261120  }
   0xd   : > { %225 = vmatpush.msra.mxu0 %v206_v0  ;;  %202 = vst.msk [vmem:[#allocation2] sm:$0x1] %vm201_vm0, %v967_v2  ;;  %303 = vmatpush.msra.mxu1 %v206_v0  ;;  %v893_v4 = vld [vmem:[%s1133_s2] ss:$0 sm:$0xff]  ;;  %s1140_s12 = smov (!%p183_p4, %s957_s12), 1 }
   0xe   : > { %371 = vmatpush.msra.mxu2 %v206_v0  ;;  %439 = vmatpush.msra.mxu3 %v206_v0  ;;  %v203_v5 = vld [vmem:[%s1132_s1] sm:$0xff]  ;;  %s845_s28 = sshll.u32 %s1140_s12, 3 }
   0xf   : > { %226 = vmatpush.msra.mxu0 %v205_v1  ;;  %304 = vmatpush.msra.mxu1 %v205_v1  ;;  %s1043_s4 = scalar_lea.vmem %s1131_s0, %s845_s28  ;;  %s1054_s8 = scalar_lea.vmem %s1134_s3, %s845_s28 }
  0x10   : > { %256 = vrot.lane.b32.xlu0 %v893_v4, %s968_s26  ;;  %372 = vmatpush.msra.mxu2 %v205_v1  ;;  %v233_v11 = vld [vmem:[%s1043_s4] sm:$0x1]  ;;  %v311_v40 = vld [vmem:[%s1043_s4 + $0x1] sm:$0x1]  ;;  %v379_v4 = vld [vmem:[%s1043_s4 + $0x2] sm:$0x1] }
  0x11   : > { %227 = vmatpush.msra.mxu0 %v204_v3  ;;  %305 = vmatpush.msra.mxu1 %v204_v3 }
  0x12   : > { %373 = vmatpush.msra.mxu2 %v204_v3  ;;  %440 = vmatpush.msra.mxu3 %v205_v1 }
  0x13   : > { %228 = vmatpush.msra.mxu0 %v203_v5  ;;  %306 = vmatpush.msra.mxu1 %v203_v5 }
  0x14   : > { %v208_v6 = vld [vmem:[#allocation2] sm:$0x1]  ;;  %374 = vmatpush.msra.mxu2 %v203_v5  ;;  %441 = vmatpush.msra.mxu3 %v204_v3 }
  0x15   : > { %v894_v7 = vld [vmem:[#allocation2] ss:$0 sm:$0xff]  ;;  %847 = vmatmul.msk.f32.vlgmr.msra.gmra.mxu0 %vm209_vm1, %v208_v6  ;;  %575 = vmatpush.msrb.mxu1 %v206_v0 }
  0x16   : > { %278 = vrot.lane.b32.xlu2 %v894_v7, %s969_s27  ;;  %442 = vmatpush.msra.mxu3 %v203_v5 }
  0x17   : > { %507 = vmatpush.msrb.mxu0 %v206_v0  ;;  %576 = vmatpush.msrb.mxu1 %v205_v1 }
  0x18   : > { %643 = vmatpush.msrb.mxu2 %v206_v0  ;;  %711 = vmatpush.msrb.mxu3 %v206_v0 }
  0x19   : > { %508 = vmatpush.msrb.mxu0 %v205_v1  ;;  %577 = vmatpush.msrb.mxu1 %v204_v3 }
  0x1a   : > { %644 = vmatpush.msrb.mxu2 %v205_v1  ;;  %712 = vmatpush.msrb.mxu3 %v205_v1 }
  0x1b   : > { %509 = vmatpush.msrb.mxu0 %v204_v3  ;;  %578 = vmatpush.msrb.mxu1 %v203_v5 }
  0x1c   : > { %645 = vmatpush.msrb.mxu2 %v204_v3  ;;  %713 = vmatpush.msrb.mxu3 %v204_v3 }
  0x1d   : > { %510 = vmatpush.msrb.mxu0 %v203_v5 }
  0x1e   : > { %646 = vmatpush.msrb.mxu2 %v203_v5  ;;  %714 = vmatpush.msrb.mxu3 %v203_v5 }
  0x70   : > { %v279_v31 = vpop.permute.xlu2 %278 }
  0x82   : > { %v1029_v8 = vpop.permute.xlu0 %256 }
  0x92   : > { %v230_v9 = vpop.f32.mrf.mxu0 }
  0x93   : > { %v259_v10 = vadd.f32 %v1029_v8, %v230_v9  ;;  %v234_v12 = vadd.f32 %v233_v11, %v230_v9 }
  0x95   : > { %261 = vrot.lane.b32.xlu0 %v259_v10, %s968_s26  ;;  %v848_v13 = vmul.f32 -1.442695, %v234_v12 }
  0x97   : > { %895 = vpow2.f32 %v848_v13 }
  0x9d   : > { %v896_v14 = vpop.eup %895 }
  0x9e   : > { %v238_v15 = vadd.f32 1.0, %v896_v14 }
  0xa0   : > { %897 = vrcp.f32 %v238_v15  ;;  %v250_v21 = vand.u32 2147483648, %v238_v15  ;;  %vm244_vm3 = vweird.f32 %v238_v15  ;;  %v248_v22 = vand.u32 2147483647, %v238_v15 }
  0xa2   : > { %v251_v24 = vor.u32 1.1754944e-38, %v250_v21  ;;  %vm249_vm5 = vcmp.eq.f32.partialorder %v248_v22, 8.507059e+37 }
  0xa6   : > { %v898_v16 = vpop.eup %897 }
  0xa7   : > { %v240_v17 = vmul.f32 %v898_v16, %v238_v15  ;;  %vm245_vm2 = vweird.f32 %v898_v16 }
  0xa8   : > { %vm246_vm4 = vmor %vm244_vm3, %vm245_vm2 }
  0xa9   : > { %v241_v18 = vsub.f32 1.0, %v240_v17 }
  0xab   : > { %v242_v19 = vmul.f32 %v898_v16, %v241_v18 }
  0xad   : > { %v243_v20 = vadd.f32 %v898_v16, %v242_v19 }
  0xaf   : > { %v247_v23 = vsel %vm246_vm4, %v898_v16, %v243_v20 }
  0xb0   : > { %v252_v25 = vsel %vm249_vm5, %v251_v24, %v247_v23 }
  0xb1   : > { %v271_v32 = vsub.f32 1.0, %v252_v25  ;;  %v281_v34 = vmul.f32 %v279_v31, %v252_v25 }
 0x107   : > { %v262_v26 = vpop.permute.xlu0 %261 }
 0x108   : > { %v264_v27 = vmul.f32 %v262_v26, %v252_v25 }
 0x10a   : > { %266 = vrot.lane.b32.xlu1 %v264_v27, %s968_s26 }
 0x17c   : > { %v267_v28 = vpop.permute.xlu1 %266 }
 0x17d   : > { %v269_v29 = vadd.f32 %v267_v28, %v233_v11 }
 0x17f   : > { %899 = vtanh.f32 %v269_v29 }
 0x185   : > { %v900_v30 = vpop.eup %899 }
 0x186   : > { %273 = vrot.lane.b32.xlu1 %v900_v30, %s970_s5 }
 0x1f8   : > { %v274_v33 = vpop.permute.xlu1 %273 }
 0x1f9   : > { %v276_v35 = vmul.f32 %v274_v33, %v271_v32  ;;  %v447_v33 = vld [vmem:[%s1043_s4 + $0x3] sm:$0x1] }
 0x1fb   : > { %v282_v36 = vadd.f32 %v281_v34, %v276_v35 }
 0x1fd   : > { %284 = vrot.lane.b32.xlu2 %v282_v36, %s970_s5 }
 0x257   : > { %v285_v37 = vpop.permute.xlu2 %284 }
 0x258   : > { %288 = vst.msk [vmem:[%s1054_s8] sm:$0x1] %vm201_vm0, %v285_v37  ;;  %849 = vmatmul.msk.f32.vlgmr.msra.gmra.mxu1 %vm209_vm1, %v285_v37 }
 0x2d5   : > { %v308_v38 = vpop.f32.mrf.mxu1 }
 0x2d6   : > { %v332_v39 = vadd.f32 %v308_v38, %v1029_v8  ;;  %v312_v41 = vadd.f32 %v311_v40, %v308_v38 }
 0x2d8   : > { %334 = vrot.lane.b32.xlu0 %v332_v39, %s968_s26  ;;  %v850_v42 = vmul.f32 -1.442695, %v312_v41 }
 0x2da   : > { %901 = vpow2.f32 %v850_v42 }
 0x2e0   : > { %v902_v43 = vpop.eup %901 }
 0x2e1   : > { %v316_v44 = vadd.f32 1.0, %v902_v43 }
 0x2e3   : > { %903 = vrcp.f32 %v316_v44  ;;  %v328_v50 = vand.u32 2147483648, %v316_v44  ;;  %vm322_vm7 = vweird.f32 %v316_v44  ;;  %v326_v51 = vand.u32 2147483647, %v316_v44 }
 0x2e5   : > { %v329_v53 = vor.u32 1.1754944e-38, %v328_v50  ;;  %vm327_vm9 = vcmp.eq.f32.partialorder %v326_v51, 8.507059e+37 }
 0x2e9   : > { %v904_v45 = vpop.eup %903 }
 0x2ea   : > { %v318_v46 = vmul.f32 %v904_v45, %v316_v44  ;;  %vm323_vm6 = vweird.f32 %v904_v45 }
 0x2eb   : > { %vm324_vm8 = vmor %vm322_vm7, %vm323_vm6 }
 0x2ec   : > { %v319_v47 = vsub.f32 1.0, %v318_v46 }
 0x2ee   : > { %v320_v48 = vmul.f32 %v904_v45, %v319_v47 }
 0x2f0   : > { %v321_v49 = vadd.f32 %v904_v45, %v320_v48 }
 0x2f2   : > { %v325_v52 = vsel %vm324_vm8, %v904_v45, %v321_v49 }
 0x2f3   : > { %v330_v55 = vsel %vm327_vm9, %v329_v53, %v325_v52 }
 0x2f4   : > { %v344_v60 = vsub.f32 1.0, %v330_v55  ;;  %v350_v62 = vmul.f32 %v330_v55, %v282_v36 }
 0x34a   : > { %v335_v54 = vpop.permute.xlu0 %334 }
 0x34b   : > { %v337_v56 = vmul.f32 %v335_v54, %v330_v55 }
 0x34d   : > { %339 = vrot.lane.b32.xlu1 %v337_v56, %s968_s26 }
 0x3bf   : > { %v340_v57 = vpop.permute.xlu1 %339 }
 0x3c0   : > { %v342_v58 = vadd.f32 %v340_v57, %v311_v40 }
 0x3c2   : > { %905 = vtanh.f32 %v342_v58 }
 0x3c8   : > { %v906_v59 = vpop.eup %905 }
 0x3c9   : > { %346 = vrot.lane.b32.xlu2 %v906_v59, %s970_s5 }
 0x423   : > { %v347_v61 = vpop.permute.xlu2 %346 }
 0x424   : > { %v349_v63 = vmul.f32 %v347_v61, %v344_v60  ;;  %v515_v61 = vld [vmem:[%s1043_s4 + $0x4] sm:$0x1] }
 0x426   : > { %v351_v0 = vadd.f32 %v350_v62, %v349_v63 }
 0x428   : > { %353 = vrot.lane.b32.xlu0 %v351_v0, %s970_s5 }
 0x49a   : > { %v354_v1 = vpop.permute.xlu0 %353 }
 0x49b   : > { %356 = vst.msk [vmem:[%s1054_s8 + $0x1] sm:$0x1] %vm201_vm0, %v354_v1  ;;  %851 = vmatmul.msk.f32.vlgmr.msra.gmra.mxu2 %vm209_vm1, %v354_v1 }
 0x51e   : > { %v376_v2 = vpop.f32.mrf.mxu2 }
 0x51f   : > { %v400_v3 = vadd.f32 %v376_v2, %v1029_v8  ;;  %v380_v5 = vadd.f32 %v379_v4, %v376_v2 }
 0x521   : > { %402 = vrot.lane.b32.xlu1 %v400_v3, %s968_s26  ;;  %v852_v6 = vmul.f32 -1.442695, %v380_v5 }
 0x523   : > { %907 = vpow2.f32 %v852_v6 }
 0x529   : > { %v908_v7 = vpop.eup %907 }
 0x52a   : > { %v384_v9 = vadd.f32 1.0, %v908_v7 }
 0x52c   : > { %909 = vrcp.f32 %v384_v9  ;;  %v396_v15 = vand.u32 2147483648, %v384_v9  ;;  %vm390_vm11 = vweird.f32 %v384_v9  ;;  %v394_v16 = vand.u32 2147483647, %v384_v9 }
 0x52e   : > { %v397_v18 = vor.u32 1.1754944e-38, %v396_v15  ;;  %vm395_vm13 = vcmp.eq.f32.partialorder %v394_v16, 8.507059e+37 }
 0x532   : > { %v910_v10 = vpop.eup %909 }
 0x533   : > { %v386_v11 = vmul.f32 %v910_v10, %v384_v9  ;;  %vm391_vm10 = vweird.f32 %v910_v10 }
 0x534   : > { %vm392_vm12 = vmor %vm390_vm11, %vm391_vm10 }
 0x535   : > { %v387_v12 = vsub.f32 1.0, %v386_v11 }
 0x537   : > { %v388_v13 = vmul.f32 %v910_v10, %v387_v12 }
 0x539   : > { %v389_v14 = vadd.f32 %v910_v10, %v388_v13 }
 0x53b   : > { %v393_v17 = vsel %vm392_vm12, %v910_v10, %v389_v14 }
 0x53c   : > { %v398_v20 = vsel %vm395_vm13, %v397_v18, %v393_v17 }
 0x53d   : > { %v412_v25 = vsub.f32 1.0, %v398_v20  ;;  %v418_v27 = vmul.f32 %v398_v20, %v351_v0 }
 0x593   : > { %v403_v19 = vpop.permute.xlu1 %402 }
 0x594   : > { %v405_v21 = vmul.f32 %v403_v19, %v398_v20 }
 0x596   : > { %407 = vrot.lane.b32.xlu2 %v405_v21, %s968_s26 }
 0x5f0   : > { %v408_v22 = vpop.permute.xlu2 %407 }
 0x5f1   : > { %v410_v23 = vadd.f32 %v408_v22, %v379_v4 }
 0x5f3   : > { %911 = vtanh.f32 %v410_v23 }
 0x5f9   : > { %v912_v24 = vpop.eup %911 }
 0x5fa   : > { %414 = vrot.lane.b32.xlu0 %v912_v24, %s970_s5 }
 0x66c   : > { %v415_v26 = vpop.permute.xlu0 %414 }
 0x66d   : > { %v417_v28 = vmul.f32 %v415_v26, %v412_v25  ;;  %v583_v26 = vld [vmem:[%s1043_s4 + $0x5] sm:$0x1] }
 0x66f   : > { %v419_v29 = vadd.f32 %v418_v27, %v417_v28 }
 0x671   : > { %421 = vrot.lane.b32.xlu1 %v419_v29, %s970_s5 }
 0x6e3   : > { %v422_v30 = vpop.permute.xlu1 %421 }
 0x6e4   : > { %424 = vst.msk [vmem:[%s1054_s8 + $0x2] sm:$0x1] %vm201_vm0, %v422_v30  ;;  %853 = vmatmul.msk.f32.vlgmr.msra.gmra.mxu3 %vm209_vm1, %v422_v30 }
 0x767   : > { %v444_v31 = vpop.f32.mrf.mxu3 }
 0x768   : > { %v468_v32 = vadd.f32 %v444_v31, %v1029_v8  ;;  %v448_v34 = vadd.f32 %v447_v33, %v444_v31 }
 0x76a   : > { %470 = vrot.lane.b32.xlu2 %v468_v32, %s968_s26  ;;  %v854_v35 = vmul.f32 -1.442695, %v448_v34 }
 0x76c   : > { %913 = vpow2.f32 %v854_v35 }
 0x772   : > { %v914_v36 = vpop.eup %913 }
 0x773   : > { %v452_v37 = vadd.f32 1.0, %v914_v36 }
 0x775   : > { %915 = vrcp.f32 %v452_v37  ;;  %v464_v43 = vand.u32 2147483648, %v452_v37  ;;  %vm458_vm15 = vweird.f32 %v452_v37  ;;  %v462_v44 = vand.u32 2147483647, %v452_v37 }
 0x777   : > { %v465_v46 = vor.u32 1.1754944e-38, %v464_v43  ;;  %vm463_vm3 = vcmp.eq.f32.partialorder %v462_v44, 8.507059e+37 }
 0x77b   : > { %v916_v38 = vpop.eup %915 }
 0x77c   : > { %v454_v39 = vmul.f32 %v916_v38, %v452_v37  ;;  %vm459_vm14 = vweird.f32 %v916_v38 }
 0x77d   : > { %vm460_vm2 = vmor %vm458_vm15, %vm459_vm14 }
 0x77e   : > { %v455_v40 = vsub.f32 1.0, %v454_v39 }
 0x780   : > { %v456_v41 = vmul.f32 %v916_v38, %v455_v40 }
 0x782   : > { %v457_v42 = vadd.f32 %v916_v38, %v456_v41 }
 0x784   : > { %v461_v45 = vsel %vm460_vm2, %v916_v38, %v457_v42 }
 0x785   : > { %v466_v48 = vsel %vm463_vm3, %v465_v46, %v461_v45 }
 0x786   : > { %v480_v53 = vsub.f32 1.0, %v466_v48  ;;  %v486_v55 = vmul.f32 %v466_v48, %v419_v29 }
 0x7c4   : > { %v471_v47 = vpop.permute.xlu2 %470 }
 0x7c5   : > { %v473_v49 = vmul.f32 %v471_v47, %v466_v48 }
 0x7c7   : > { %475 = vrot.lane.b32.xlu0 %v473_v49, %s968_s26 }
 0x839   : > { %v476_v50 = vpop.permute.xlu0 %475 }
 0x83a   : > { %v478_v51 = vadd.f32 %v476_v50, %v447_v33 }
 0x83c   : > { %917 = vtanh.f32 %v478_v51 }
 0x842   : > { %v918_v52 = vpop.eup %917 }
 0x843   : > { %482 = vrot.lane.b32.xlu1 %v918_v52, %s970_s5 }
 0x8b5   : > { %v483_v54 = vpop.permute.xlu1 %482 }
 0x8b6   : > { %v485_v56 = vmul.f32 %v483_v54, %v480_v53  ;;  %v651_v54 = vld [vmem:[%s1043_s4 + $0x6] sm:$0x1] }
 0x8b8   : > { %v487_v57 = vadd.f32 %v486_v55, %v485_v56 }
 0x8ba   : > { %489 = vrot.lane.b32.xlu2 %v487_v57, %s970_s5 }
 0x914   : > { %v490_v58 = vpop.permute.xlu2 %489 }
 0x915   : > { %492 = vst.msk [vmem:[%s1054_s8 + $0x3] sm:$0x1] %vm201_vm0, %v490_v58  ;;  %855 = vmatmul.msk.f32.vlgmr.msrb.gmra.mxu0 %vm209_vm1, %v490_v58 }
 0x992   : > { %v512_v59 = vpop.f32.mrf.mxu0 }
 0x993   : > { %v536_v60 = vadd.f32 %v512_v59, %v1029_v8  ;;  %v516_v62 = vadd.f32 %v515_v61, %v512_v59 }
 0x995   : > { %538 = vrot.lane.b32.xlu0 %v536_v60, %s968_s26  ;;  %v856_v63 = vmul.f32 -1.442695, %v516_v62 }
 0x997   : > { %919 = vpow2.f32 %v856_v63 }
 0x99d   : > { %v920_v0 = vpop.eup %919 }
 0x99e   : > { %v520_v1 = vadd.f32 1.0, %v920_v0 }
 0x9a0   : > { %921 = vrcp.f32 %v520_v1  ;;  %v532_v7 = vand.u32 2147483648, %v520_v1  ;;  %vm526_vm5 = vweird.f32 %v520_v1  ;;  %v530_v9 = vand.u32 2147483647, %v520_v1 }
 0x9a2   : > { %v533_v11 = vor.u32 1.1754944e-38, %v532_v7  ;;  %vm531_vm7 = vcmp.eq.f32.partialorder %v530_v9, 8.507059e+37 }
 0x9a6   : > { %v922_v2 = vpop.eup %921 }
 0x9a7   : > { %v522_v3 = vmul.f32 %v922_v2, %v520_v1  ;;  %vm527_vm4 = vweird.f32 %v922_v2 }
 0x9a8   : > { %vm528_vm6 = vmor %vm526_vm5, %vm527_vm4 }
 0x9a9   : > { %v523_v4 = vsub.f32 1.0, %v522_v3 }
 0x9ab   : > { %v524_v5 = vmul.f32 %v922_v2, %v523_v4 }
 0x9ad   : > { %v525_v6 = vadd.f32 %v922_v2, %v524_v5 }
 0x9af   : > { %v529_v10 = vsel %vm528_vm6, %v922_v2, %v525_v6 }
 0x9b0   : > { %v534_v13 = vsel %vm531_vm7, %v533_v11, %v529_v10 }
 0x9b1   : > { %v548_v18 = vsub.f32 1.0, %v534_v13  ;;  %v554_v20 = vmul.f32 %v534_v13, %v487_v57 }
 0xa07   : > { %v539_v12 = vpop.permute.xlu0 %538 }
 0xa08   : > { %v541_v14 = vmul.f32 %v539_v12, %v534_v13 }
 0xa0a   : > { %543 = vrot.lane.b32.xlu1 %v541_v14, %s968_s26 }
 0xa7c   : > { %v544_v15 = vpop.permute.xlu1 %543 }
 0xa7d   : > { %v546_v16 = vadd.f32 %v544_v15, %v515_v61 }
 0xa7f   : > { %923 = vtanh.f32 %v546_v16 }
 0xa85   : > { %v924_v17 = vpop.eup %923 }
 0xa86   : > { %550 = vrot.lane.b32.xlu2 %v924_v17, %s970_s5 }
 0xae0   : > { %v551_v19 = vpop.permute.xlu2 %550 }
 0xae1   : > { %v553_v21 = vmul.f32 %v551_v19, %v548_v18  ;;  %v719_v19 = vld [vmem:[%s1043_s4 + $0x7] sm:$0x1] }
 0xae3   : > { %v555_v22 = vadd.f32 %v554_v20, %v553_v21 }
 0xae5   : > { %557 = vrot.lane.b32.xlu0 %v555_v22, %s970_s5 }
 0xb57   : > { %v558_v23 = vpop.permute.xlu0 %557 }
 0xb58   : > { %560 = vst.msk [vmem:[%s1054_s8 + $0x4] sm:$0x1] %vm201_vm0, %v558_v23  ;;  %857 = vmatmul.msk.f32.vlgmr.msrb.gmra.mxu1 %vm209_vm1, %v558_v23 }
 0xbd5   : > { %v580_v24 = vpop.f32.mrf.mxu1 }
 0xbd6   : > { %v604_v25 = vadd.f32 %v580_v24, %v1029_v8  ;;  %v584_v27 = vadd.f32 %v583_v26, %v580_v24 }
 0xbd8   : > { %606 = vrot.lane.b32.xlu1 %v604_v25, %s968_s26  ;;  %v858_v28 = vmul.f32 -1.442695, %v584_v27 }
 0xbda   : > { %925 = vpow2.f32 %v858_v28 }
 0xbe0   : > { %v926_v29 = vpop.eup %925 }
 0xbe1   : > { %v588_v30 = vadd.f32 1.0, %v926_v29 }
 0xbe3   : > { %927 = vrcp.f32 %v588_v30  ;;  %v600_v36 = vand.u32 2147483648, %v588_v30  ;;  %vm594_vm9 = vweird.f32 %v588_v30  ;;  %v598_v37 = vand.u32 2147483647, %v588_v30 }
 0xbe5   : > { %v601_v39 = vor.u32 1.1754944e-38, %v600_v36  ;;  %vm599_vm11 = vcmp.eq.f32.partialorder %v598_v37, 8.507059e+37 }
 0xbe9   : > { %v928_v31 = vpop.eup %927 }
 0xbea   : > { %v590_v32 = vmul.f32 %v928_v31, %v588_v30  ;;  %vm595_vm8 = vweird.f32 %v928_v31 }
 0xbeb   : > { %vm596_vm10 = vmor %vm594_vm9, %vm595_vm8 }
 0xbec   : > { %v591_v33 = vsub.f32 1.0, %v590_v32 }
 0xbee   : > { %v592_v34 = vmul.f32 %v928_v31, %v591_v33 }
 0xbf0   : > { %v593_v35 = vadd.f32 %v928_v31, %v592_v34 }
 0xbf2   : > { %v597_v38 = vsel %vm596_vm10, %v928_v31, %v593_v35 }
 0xbf3   : > { %v602_v41 = vsel %vm599_vm11, %v601_v39, %v597_v38 }
 0xbf4   : > { %v616_v46 = vsub.f32 1.0, %v602_v41  ;;  %v622_v48 = vmul.f32 %v602_v41, %v555_v22 }
 0xc4a   : > { %v607_v40 = vpop.permute.xlu1 %606 }
 0xc4b   : > { %v609_v42 = vmul.f32 %v607_v40, %v602_v41 }
 0xc4d   : > { %611 = vrot.lane.b32.xlu2 %v609_v42, %s968_s26 }
 0xca7   : > { %v612_v43 = vpop.permute.xlu2 %611 }
 0xca8   : > { %v614_v44 = vadd.f32 %v612_v43, %v583_v26 }
 0xcaa   : > { %929 = vtanh.f32 %v614_v44 }
 0xcb0   : > { %v930_v45 = vpop.eup %929 }
 0xcb1   : > { %618 = vrot.lane.b32.xlu0 %v930_v45, %s970_s5 }
 0xd23   : > { %v619_v47 = vpop.permute.xlu0 %618 }
 0xd24   : > { %v621_v49 = vmul.f32 %v619_v47, %v616_v46 }
 0xd26   : > { %v623_v50 = vadd.f32 %v622_v48, %v621_v49 }
 0xd28   : > { %625 = vrot.lane.b32.xlu1 %v623_v50, %s970_s5 }
 0xd9a   : > { %v626_v51 = vpop.permute.xlu1 %625 }
 0xd9b   : > { %628 = vst.msk [vmem:[%s1054_s8 + $0x5] sm:$0x1] %vm201_vm0, %v626_v51  ;;  %859 = vmatmul.msk.f32.vlgmr.msrb.gmra.mxu2 %vm209_vm1, %v626_v51 }
 0xe1e   : > { %v648_v52 = vpop.f32.mrf.mxu2 }
 0xe1f   : > { %v672_v53 = vadd.f32 %v648_v52, %v1029_v8  ;;  %v652_v55 = vadd.f32 %v651_v54, %v648_v52 }
 0xe21   : > { %674 = vrot.lane.b32.xlu2 %v672_v53, %s968_s26  ;;  %v860_v56 = vmul.f32 -1.442695, %v652_v55 }
 0xe23   : > { %931 = vpow2.f32 %v860_v56 }
 0xe29   : > { %v932_v57 = vpop.eup %931 }
 0xe2a   : > { %v656_v58 = vadd.f32 1.0, %v932_v57 }
 0xe2c   : > { %933 = vrcp.f32 %v656_v58  ;;  %v668_v0 = vand.u32 2147483648, %v656_v58  ;;  %vm662_vm13 = vweird.f32 %v656_v58  ;;  %v666_v1 = vand.u32 2147483647, %v656_v58 }
 0xe2e   : > { %v669_v3 = vor.u32 1.1754944e-38, %v668_v0  ;;  %vm667_vm15 = vcmp.eq.f32.partialorder %v666_v1, 8.507059e+37 }
 0xe32   : > { %v934_v59 = vpop.eup %933 }
 0xe33   : > { %v658_v60 = vmul.f32 %v934_v59, %v656_v58  ;;  %vm663_vm12 = vweird.f32 %v934_v59 }
 0xe34   : > { %vm664_vm14 = vmor %vm662_vm13, %vm663_vm12 }
 0xe35   : > { %v659_v61 = vsub.f32 1.0, %v658_v60 }
 0xe37   : > { %v660_v62 = vmul.f32 %v934_v59, %v659_v61 }
 0xe39   : > { %v661_v63 = vadd.f32 %v934_v59, %v660_v62 }
 0xe3b   : > { %v665_v2 = vsel %vm664_vm14, %v934_v59, %v661_v63 }
 0xe3c   : > { %v670_v5 = vsel %vm667_vm15, %v669_v3, %v665_v2 }
 0xe3d   : > { %v684_v11 = vsub.f32 1.0, %v670_v5  ;;  %v690_v13 = vmul.f32 %v670_v5, %v623_v50 }
 0xe7b   : > { %v675_v4 = vpop.permute.xlu2 %674 }
 0xe7c   : > { %v677_v6 = vmul.f32 %v675_v4, %v670_v5 }
 0xe7e   : > { %679 = vrot.lane.b32.xlu0 %v677_v6, %s968_s26 }
 0xef0   : > { %v680_v7 = vpop.permute.xlu0 %679 }
 0xef1   : > { %v682_v9 = vadd.f32 %v680_v7, %v651_v54 }
 0xef3   : > { %935 = vtanh.f32 %v682_v9 }
 0xef9   : > { %v936_v10 = vpop.eup %935 }
 0xefa   : > { %686 = vrot.lane.b32.xlu1 %v936_v10, %s970_s5 }
 0xf6c   : > { %v687_v12 = vpop.permute.xlu1 %686 }
 0xf6d   : > { %v689_v14 = vmul.f32 %v687_v12, %v684_v11 }
 0xf6f   : > { %v691_v15 = vadd.f32 %v690_v13, %v689_v14 }
 0xf71   : > { %693 = vrot.lane.b32.xlu2 %v691_v15, %s970_s5 }
 0xfcb   : > { %v694_v16 = vpop.permute.xlu2 %693 }
 0xfcc   : > { %696 = vst.msk [vmem:[%s1054_s8 + $0x6] sm:$0x1] %vm201_vm0, %v694_v16  ;;  %861 = vmatmul.msk.f32.vlgmr.msrb.gmra.mxu3 %vm209_vm1, %v694_v16 }
0x104f   : > { %v716_v17 = vpop.f32.mrf.mxu3 }
0x1050   : > { %v740_v18 = vadd.f32 %v716_v17, %v1029_v8  ;;  %v720_v20 = vadd.f32 %v719_v19, %v716_v17 }
0x1052   : > { %742 = vrot.lane.b32.xlu0 %v740_v18, %s968_s26  ;;  %v862_v21 = vmul.f32 -1.442695, %v720_v20 }
0x1054   : > { %937 = vpow2.f32 %v862_v21 }
0x105a   : > { %v938_v22 = vpop.eup %937 }
0x105b   : > { %v724_v23 = vadd.f32 1.0, %v938_v22 }
0x105d   : > { %939 = vrcp.f32 %v724_v23  ;;  %v736_v29 = vand.u32 2147483648, %v724_v23  ;;  %vm730_vm1 = vweird.f32 %v724_v23  ;;  %v734_v30 = vand.u32 2147483647, %v724_v23 }
0x105f   : > { %v737_v31 = vor.u32 1.1754944e-38, %v736_v29  ;;  %vm735_vm4 = vcmp.eq.f32.partialorder %v734_v30, 8.507059e+37 }
0x1063   : > { %v940_v24 = vpop.eup %939 }
0x1064   : > { %v726_v25 = vmul.f32 %v940_v24, %v724_v23  ;;  %vm731_vm2 = vweird.f32 %v940_v24 }
0x1065   : > { %vm732_vm3 = vmor %vm730_vm1, %vm731_vm2 }
0x1066   : > { %v727_v26 = vsub.f32 1.0, %v726_v25 }
0x1068   : > { %v728_v27 = vmul.f32 %v940_v24, %v727_v26 }
0x106a   : > { %v729_v28 = vadd.f32 %v940_v24, %v728_v27 }
0x106c   : > { %v733_v8 = vsel %vm732_vm3, %v940_v24, %v729_v28 }
0x106d   : > { %v738_v33 = vsel %vm735_vm4, %v737_v31, %v733_v8 }
0x106e   : > { %v752_v38 = vsub.f32 1.0, %v738_v33  ;;  %v758_v40 = vmul.f32 %v738_v33, %v691_v15 }
0x10c4   : > { %v743_v32 = vpop.permute.xlu0 %742 }
0x10c5   : > { %v745_v34 = vmul.f32 %v743_v32, %v738_v33 }
0x10c7   : > { %747 = vrot.lane.b32.xlu1 %v745_v34, %s968_s26 }
0x1139   : > { %v748_v35 = vpop.permute.xlu1 %747 }
0x113a   : > { %v750_v36 = vadd.f32 %v748_v35, %v719_v19 }
0x113c   : > { %941 = vtanh.f32 %v750_v36 }
0x1142   : > { %v942_v37 = vpop.eup %941 }
0x1143   : > { %754 = vrot.lane.b32.xlu2 %v942_v37, %s970_s5 }
0x119d   : > { %v755_v39 = vpop.permute.xlu2 %754 }
0x119e   : > { %v757_v41 = vmul.f32 %v755_v39, %v752_v38 }
0x11a0   : > { %v759_v42 = vadd.f32 %v758_v40, %v757_v41 }
0x11a2   : > { %761 = vrot.lane.b32.xlu0 %v759_v42, %s970_s5 }
0x1214   : > { %v762_v43 = vpop.permute.xlu0 %761 }
0x1215   : > { %764 = vst.msk [vmem:[%s1054_s8 + $0x7] sm:$0x1] %vm201_vm0, %v762_v43 }
0x1216   : > { %765 = vst.msk [vmem:[#allocation2] sm:$0x1] %vm201_vm0, %v762_v43 }
0x1217 PF: > { %s13_s14 = sadd.s32 1, %s965_s14   ;;  %s1135_s12 = smov %s961_s13 }
0x1218   : > { %p10_p5 = scmp.ge.s32.totalorder %s13_s14, 4   ;;  %s1136_s13 = smov %s1138_s15 }
0x121a   :  { %12 = sbr.rel (!%p10_p5) target bundleno = 2 (0x2), region = 66 }

</bundles_post_ra>
